<compile_context>
chip_gen: v6e
topology: v6e:2x2x1
jax: 0.10.0
libtpu: 0.0.40
codegen_flags: <defaults>
</compile_context>

<pallas_src>
import math

import jax
import jax.numpy as jnp
from jax.experimental import pallas as pl
from jax.experimental.pallas import tpu as pltpu

# Full-precision f32 matmuls for both the kernel trace and the reference so
# the correctness check is meaningful on TPU.
jax.config.update("jax_default_matmul_precision", "highest")

# ---- config (GPTConfig analogue) -------------------------------------------
HIDDEN = 32                      # config.hidden_dim
N_HEAD = 4                       # config.n_head
HEAD_SIZE = HIDDEN // N_HEAD
SEQ = 8                          # sequence length (<= config.block_size)
BATCH = 2
DROPOUT = 0.1                    # unused at inference
LANE = 128                       # TPU lane width (weights / output padded to this)
NEG_BIG = -1e30                  # additive mask fill; safe because every row of the
                                 # block-causal mask keeps its diagonal unmasked

assert HIDDEN % N_HEAD == 0
assert SEQ & (SEQ - 1) == 0, "in-kernel block mask uses `row & -SEQ` (power of two)"
assert 3 * HIDDEN <= LANE, "q|k|v packing assumes the fused projection fits in 128 lanes"


# ---- Pallas kernel ----------------------------------------------------------
def mha_kernel(x_ref, w_ref, b_ref, o_ref):
    """Single-step MHA forward on the flattened (B*T, C) slab.

    w_ref: (2, C, LANE) -- [0] = packed [wq*scale | wk | wv | 0-pad],
                           [1] = [wp | 0-pad]
    b_ref: (2, 1, LANE) -- matching biases.
    """
    x = x_ref[...]                                     # (BT, C) f32
    bt = x.shape[0]

    # Fused q/k/v projection: ONE (BT, C) @ (C, 128) MXU pass.
    # lanes [0,C)=q (1/sqrt(H) pre-folded), [C,2C)=k, [2C,3C)=v, rest zero.
    qkv = jnp.dot(x, w_ref[0], preferred_element_type=jnp.float32) + b_ref[0]

    # Additive block-causal mask on the flattened (B*T) axis: causal within
    # each SEQ-long block, no attention across blocks (batches).  Rows are
    # batch-major / seq-minor and B*T is a multiple of SEQ (asserted in the
    # wrapper).  Every row keeps its diagonal unmasked, so the softmax never
    # sees a fully-masked row.
    row = jax.lax.broadcasted_iota(jnp.int32, (bt, bt), 0)
    col = jax.lax.broadcasted_iota(jnp.int32, (bt, bt), 1)
    in_block_causal = (col <= row) & (col >= (row & -SEQ))     # SEQ power of two
    s_bias = jnp.where(in_block_causal, 0.0, NEG_BIG).astype(jnp.float32)

    # Per-head attention, statically unrolled (N_HEAD = 4).  Scores use the
    # 'td,sd->ts' (NT) contraction directly -- no materialized k transpose.
    head_outs = []
    for n in range(N_HEAD):
        lo = n * HEAD_SIZE
        q = qkv[:, lo:lo + HEAD_SIZE]                              # (BT, H), pre-scaled
        k = qkv[:, HIDDEN + lo:HIDDEN + lo + HEAD_SIZE]            # (BT, H)
        v = qkv[:, 2 * HIDDEN + lo:2 * HIDDEN + lo + HEAD_SIZE]    # (BT, H)
        s = jnp.einsum("td,sd->ts", q, k,
                       preferred_element_type=jnp.float32) + s_bias
        s = s - jnp.max(s, axis=-1, keepdims=True)
        p = jnp.exp(s)
        p = p / jnp.sum(p, axis=-1, keepdims=True)     # exact (no approx reciprocal)
        head_outs.append(jnp.dot(p, v, preferred_element_type=jnp.float32))

    # Head concat (lane-wise) + output projection as ONE (BT, C) @ (C, 128)
    # matmul: the head reduction happens inside the MXU accumulator.  The
    # projection weight/bias are zero-padded to 128 lanes so this store is an
    # unmasked, (8,128)-tile-aligned vst; the wrapper slices the pad off.
    o_cat = jnp.concatenate(head_outs, axis=-1)                    # (BT, C)
    y = jnp.dot(o_cat, w_ref[1], preferred_element_type=jnp.float32) + b_ref[1]
    # TODO(synk): nn.Dropout is identity at inference time; no stochastic drop applied.
    o_ref[...] = y.astype(o_ref.dtype)


# ---- one-time weight packing (hoisted out of the forward path) ---------------
def pack_params(params):
    """Returns W: (2, HIDDEN, LANE) f32, B: (2, 1, LANE) f32."""
    scale = 1.0 / math.sqrt(HEAD_SIZE)
    wqkv = jnp.concatenate([params["wq"] * scale, params["wk"], params["wv"]],
                           axis=1)                                  # (C, 3C)
    bqkv = jnp.concatenate([params["bq"] * scale, params["bk"], params["bv"]],
                           axis=1)                                  # (1, 3C)
    wqkv = jnp.pad(wqkv, ((0, 0), (0, LANE - 3 * HIDDEN)))          # (C, LANE)
    bqkv = jnp.pad(bqkv, ((0, 0), (0, LANE - 3 * HIDDEN)))          # (1, LANE)
    wp = jnp.pad(params["wp"], ((0, 0), (0, LANE - HIDDEN)))        # (C, LANE)
    bp = jnp.pad(params["bp"], ((0, 0), (0, LANE - HIDDEN)))        # (1, LANE)
    W = jnp.stack([wqkv, wp], axis=0)                               # (2, C, LANE)
    B = jnp.stack([bqkv, bp], axis=0)                               # (2, 1, LANE)
    return W, B


# ---- forward wrapper ---------------------------------------------------------
def multi_head_attention(x, W, B):
    """x: (B, T, C); W/B: packed weights from pack_params (precomputed once)."""
    bsz, t, c = x.shape
    assert c == HIDDEN and t == SEQ, "block-causal mask layout assumes T == SEQ"
    x_flat = x.reshape(bsz * t, c)        # batch-major, seq-minor rows

    vmem = pl.BlockSpec(memory_space=pltpu.MemorySpace.VMEM)
    out = pl.pallas_call(
        mha_kernel,
        out_shape=jax.ShapeDtypeStruct((bsz * t, LANE), x.dtype),
        in_specs=[vmem, vmem, vmem],
        out_specs=vmem,
        # grid=() on purpose: ~0.3 MFLOP total, latency / fixed-overhead bound;
        # a parallel batch grid axis (incl. feeding v7x's 2nd TensorCore) would
        # only add per-step pipeline + sync overhead at this size.
        # Scaling guard: the per-head (B*T, B*T) score slab and the single grid
        # step grow quadratically in B*T; at larger shapes re-introduce a
        # query-row grid with (8,128)-aligned BlockSpec tiles,
        # dimension_semantics, and an explicit vmem_limit_bytes (v7x: 64 MiB).
    )(x_flat, W, B)

    return out[:, :c].reshape(bsz, t, c)


# ---- pure-JAX reference for validation --------------------------------------
def reference(x, params):
    q = x @ params["wq"] + params["bq"][0]
    k = x @ params["wk"] + params["bk"][0]
    v = x @ params["wv"] + params["bv"][0]
    B, T, C = x.shape
    causal = jnp.tril(jnp.ones((T, T), dtype=bool))
    outs = []
    for h in range(N_HEAD):
        sl = slice(h * HEAD_SIZE, (h + 1) * HEAD_SIZE)
        s = jnp.einsum("btd,bsd->bts", q[..., sl], k[..., sl]) / math.sqrt(HEAD_SIZE)
        s = jnp.where(causal, s, -jnp.inf)
        p = jax.nn.softmax(s, axis=-1)
        outs.append(jnp.einsum("bts,bsd->btd", p, v[..., sl]))
    cat = jnp.concatenate(outs, axis=-1)
    return cat @ params["wp"] + params["bp"][0]


# ---- deterministic parameter init + driver ----------------------------------
def init_params(key):
    ks = jax.random.split(key, 8)
    bound_in = 1.0 / math.sqrt(HIDDEN)

    def u(k, shape, bound):
        return jax.random.uniform(k, shape, jnp.float32, -bound, bound)

    # per-head Linear(hidden, head_size) packed along output dim -> (C, C);
    # weights stored as (in_features, out_features) so y = x @ W + b.
    return {
        "wq": u(ks[0], (HIDDEN, HIDDEN), bound_in),
        "bq": u(ks[1], (1, HIDDEN), bound_in),
        "wk": u(ks[2], (HIDDEN, HIDDEN), bound_in),
        "bk": u(ks[3], (1, HIDDEN), bound_in),
        "wv": u(ks[4], (HIDDEN, HIDDEN), bound_in),
        "bv": u(ks[5], (1, HIDDEN), bound_in),
        "wp": u(ks[6], (HIDDEN, HIDDEN), bound_in),   # proj: Linear(hidden, hidden)
        "bp": u(ks[7], (1, HIDDEN), bound_in),
    }


if __name__ == "__main__":
    key = jax.random.PRNGKey(0)
    kx, kp = jax.random.split(key)
    x = jax.random.normal(kx, (BATCH, SEQ, HIDDEN), dtype=jnp.float32)
    params = init_params(kp)

    # One-time packing, hoisted out of the forward path (perf feedback #1).
    W, B = pack_params(params)

    out = jax.block_until_ready(multi_head_attention(x, W, B))
    ref = reference(x, params)

    assert out.shape == (BATCH, SEQ, HIDDEN)
    err = jnp.max(jnp.abs(out - ref))
    # Exact softmax divide + "highest" matmul precision -> tight tolerance again.
    assert jnp.allclose(out, ref, atol=1e-4, rtol=1e-4), (
        f"mismatch vs JAX reference (max abs err = {err})")

    print("KERNEL_OK")
</pallas_src>

<mosaic_0001>
module attributes {stable_mosaic.version = 11 : i64} {
  func.func @mha_kernel(%arg0: memref<16x32xf32, #tpu.memory_space<vmem>>, %arg1: memref<2x32x128xf32, #tpu.memory_space<vmem>>, %arg2: memref<2x1x128xf32, #tpu.memory_space<vmem>>, %arg3: memref<16x128xf32, #tpu.memory_space<vmem>>) attributes {dimension_semantics = [], scalar_prefetch = 0 : i64, scratch_operands = 0 : i64, tpu.core_type = #tpu.core_type<tc>} {
    %c0 = arith.constant 0 : index
    %c0_0 = arith.constant 0 : index
    %0 = vector.load %arg0[%c0, %c0_0] : memref<16x32xf32, #tpu.memory_space<vmem>>, vector<16x32xf32>
    %c0_1 = arith.constant 0 : index
    %c0_2 = arith.constant 0 : index
    %c0_3 = arith.constant 0 : index
    %1 = vector.load %arg1[%c0_1, %c0_2, %c0_3] : memref<2x32x128xf32, #tpu.memory_space<vmem>>, vector<1x32x128xf32>
    %2 = vector.shape_cast %1 : vector<1x32x128xf32> to vector<32x128xf32>
    %cst = arith.constant dense<0.000000e+00> : vector<16x128xf32>
    %3 = tpu.matmul %0, %2, %cst {dimension_numbers = #tpu.dot_dimension_numbers<[1], [0], [0], [1], [0, 0, 1, 1], [], []>, precision = #tpu.contract_precision<fp32>} : vector<16x32xf32>, vector<32x128xf32>, vector<16x128xf32> -> vector<16x128xf32>
    %c0_4 = arith.constant 0 : index
    %c0_5 = arith.constant 0 : index
    %c0_6 = arith.constant 0 : index
    %4 = vector.load %arg2[%c0_4, %c0_5, %c0_6] : memref<2x1x128xf32, #tpu.memory_space<vmem>>, vector<1x1x128xf32>
    %5 = vector.shape_cast %4 : vector<1x1x128xf32> to vector<1x128xf32>
    %6 = vector.broadcast %5 : vector<1x128xf32> to vector<16x128xf32>
    %7 = arith.addf %3, %6 : vector<16x128xf32>
    %8 = tpu.iota {dimensions = array<i32: 0>} : vector<16x16xi32>
    %9 = tpu.iota {dimensions = array<i32: 1>} : vector<16x16xi32>
    %10 = arith.cmpi sle, %9, %8 : vector<16x16xi32>
    %c-8_i32 = arith.constant -8 : i32
    %11 = vector.broadcast %c-8_i32 : i32 to vector<16x16xi32>
    %12 = arith.andi %8, %11 : vector<16x16xi32>
    %13 = arith.cmpi sge, %9, %12 : vector<16x16xi32>
    %14 = arith.andi %10, %13 : vector<16x16xi1>
    %cst_7 = arith.constant 0.000000e+00 : f32
    %cst_8 = arith.constant -1.000000e+30 : f32
    %15 = vector.broadcast %cst_7 : f32 to vector<16x16xf32>
    %16 = vector.broadcast %cst_8 : f32 to vector<16x16xf32>
    %17 = arith.select %14, %15, %16 : vector<16x16xi1>, vector<16x16xf32>
    %18 = vector.extract_strided_slice %7 {offsets = [0, 0], sizes = [16, 8], strides = [1, 1]} : vector<16x128xf32> to vector<16x8xf32>
    %19 = vector.extract_strided_slice %7 {offsets = [0, 32], sizes = [16, 8], strides = [1, 1]} : vector<16x128xf32> to vector<16x8xf32>
    %20 = vector.extract_strided_slice %7 {offsets = [0, 64], sizes = [16, 8], strides = [1, 1]} : vector<16x128xf32> to vector<16x8xf32>
    "tpu.trace_start"() <{level = 10 : i32, message = "td,sd->ts"}> : () -> ()
    %cst_9 = arith.constant dense<0.000000e+00> : vector<16x16xf32>
    %21 = tpu.matmul %18, %19, %cst_9 {dimension_numbers = #tpu.dot_dimension_numbers<[1], [1], [0], [0], [0, 0, 1, 0], [], []>, precision = #tpu.contract_precision<fp32>} : vector<16x8xf32>, vector<16x8xf32>, vector<16x16xf32> -> vector<16x16xf32>
    "tpu.trace_stop"() : () -> ()
    %22 = arith.addf %21, %17 : vector<16x16xf32>
    %cst_10 = arith.constant dense<0xFF800000> : vector<16xf32>
    %23 = vector.multi_reduction <maximumf>, %22, %cst_10 [1] : vector<16x16xf32> to vector<16xf32>
    %24 = vector.shape_cast %23 : vector<16xf32> to vector<16x1xf32>
    %25 = vector.broadcast %24 : vector<16x1xf32> to vector<16x16xf32>
    %26 = arith.subf %22, %25 : vector<16x16xf32>
    %27 = math.exp %26 : vector<16x16xf32>
    %cst_11 = arith.constant dense<0.000000e+00> : vector<16xf32>
    %28 = vector.multi_reduction <add>, %27, %cst_11 [1] : vector<16x16xf32> to vector<16xf32>
    %29 = vector.shape_cast %28 : vector<16xf32> to vector<16x1xf32>
    %30 = vector.broadcast %29 : vector<16x1xf32> to vector<16x16xf32>
    %31 = arith.divf %27, %30 : vector<16x16xf32>
    %cst_12 = arith.constant dense<0.000000e+00> : vector<16x8xf32>
    %32 = tpu.matmul %31, %20, %cst_12 {dimension_numbers = #tpu.dot_dimension_numbers<[1], [0], [0], [1], [0, 0, 1, 1], [], []>, precision = #tpu.contract_precision<fp32>} : vector<16x16xf32>, vector<16x8xf32>, vector<16x8xf32> -> vector<16x8xf32>
    %33 = vector.extract_strided_slice %7 {offsets = [0, 8], sizes = [16, 8], strides = [1, 1]} : vector<16x128xf32> to vector<16x8xf32>
    %34 = vector.extract_strided_slice %7 {offsets = [0, 40], sizes = [16, 8], strides = [1, 1]} : vector<16x128xf32> to vector<16x8xf32>
    %35 = vector.extract_strided_slice %7 {offsets = [0, 72], sizes = [16, 8], strides = [1, 1]} : vector<16x128xf32> to vector<16x8xf32>
    "tpu.trace_start"() <{level = 10 : i32, message = "td,sd->ts"}> : () -> ()
    %cst_13 = arith.constant dense<0.000000e+00> : vector<16x16xf32>
    %36 = tpu.matmul %33, %34, %cst_13 {dimension_numbers = #tpu.dot_dimension_numbers<[1], [1], [0], [0], [0, 0, 1, 0], [], []>, precision = #tpu.contract_precision<fp32>} : vector<16x8xf32>, vector<16x8xf32>, vector<16x16xf32> -> vector<16x16xf32>
    "tpu.trace_stop"() : () -> ()
    %37 = arith.addf %36, %17 : vector<16x16xf32>
    %cst_14 = arith.constant dense<0xFF800000> : vector<16xf32>
    %38 = vector.multi_reduction <maximumf>, %37, %cst_14 [1] : vector<16x16xf32> to vector<16xf32>
    %39 = vector.shape_cast %38 : vector<16xf32> to vector<16x1xf32>
    %40 = vector.broadcast %39 : vector<16x1xf32> to vector<16x16xf32>
    %41 = arith.subf %37, %40 : vector<16x16xf32>
    %42 = math.exp %41 : vector<16x16xf32>
    %cst_15 = arith.constant dense<0.000000e+00> : vector<16xf32>
    %43 = vector.multi_reduction <add>, %42, %cst_15 [1] : vector<16x16xf32> to vector<16xf32>
    %44 = vector.shape_cast %43 : vector<16xf32> to vector<16x1xf32>
    %45 = vector.broadcast %44 : vector<16x1xf32> to vector<16x16xf32>
    %46 = arith.divf %42, %45 : vector<16x16xf32>
    %cst_16 = arith.constant dense<0.000000e+00> : vector<16x8xf32>
    %47 = tpu.matmul %46, %35, %cst_16 {dimension_numbers = #tpu.dot_dimension_numbers<[1], [0], [0], [1], [0, 0, 1, 1], [], []>, precision = #tpu.contract_precision<fp32>} : vector<16x16xf32>, vector<16x8xf32>, vector<16x8xf32> -> vector<16x8xf32>
    %48 = vector.extract_strided_slice %7 {offsets = [0, 16], sizes = [16, 8], strides = [1, 1]} : vector<16x128xf32> to vector<16x8xf32>
    %49 = vector.extract_strided_slice %7 {offsets = [0, 48], sizes = [16, 8], strides = [1, 1]} : vector<16x128xf32> to vector<16x8xf32>
    %50 = vector.extract_strided_slice %7 {offsets = [0, 80], sizes = [16, 8], strides = [1, 1]} : vector<16x128xf32> to vector<16x8xf32>
    "tpu.trace_start"() <{level = 10 : i32, message = "td,sd->ts"}> : () -> ()
    %cst_17 = arith.constant dense<0.000000e+00> : vector<16x16xf32>
    %51 = tpu.matmul %48, %49, %cst_17 {dimension_numbers = #tpu.dot_dimension_numbers<[1], [1], [0], [0], [0, 0, 1, 0], [], []>, precision = #tpu.contract_precision<fp32>} : vector<16x8xf32>, vector<16x8xf32>, vector<16x16xf32> -> vector<16x16xf32>
    "tpu.trace_stop"() : () -> ()
    %52 = arith.addf %51, %17 : vector<16x16xf32>
    %cst_18 = arith.constant dense<0xFF800000> : vector<16xf32>
    %53 = vector.multi_reduction <maximumf>, %52, %cst_18 [1] : vector<16x16xf32> to vector<16xf32>
    %54 = vector.shape_cast %53 : vector<16xf32> to vector<16x1xf32>
    %55 = vector.broadcast %54 : vector<16x1xf32> to vector<16x16xf32>
    %56 = arith.subf %52, %55 : vector<16x16xf32>
    %57 = math.exp %56 : vector<16x16xf32>
    %cst_19 = arith.constant dense<0.000000e+00> : vector<16xf32>
    %58 = vector.multi_reduction <add>, %57, %cst_19 [1] : vector<16x16xf32> to vector<16xf32>
    %59 = vector.shape_cast %58 : vector<16xf32> to vector<16x1xf32>
    %60 = vector.broadcast %59 : vector<16x1xf32> to vector<16x16xf32>
    %61 = arith.divf %57, %60 : vector<16x16xf32>
    %cst_20 = arith.constant dense<0.000000e+00> : vector<16x8xf32>
    %62 = tpu.matmul %61, %50, %cst_20 {dimension_numbers = #tpu.dot_dimension_numbers<[1], [0], [0], [1], [0, 0, 1, 1], [], []>, precision = #tpu.contract_precision<fp32>} : vector<16x16xf32>, vector<16x8xf32>, vector<16x8xf32> -> vector<16x8xf32>
    %63 = vector.extract_strided_slice %7 {offsets = [0, 24], sizes = [16, 8], strides = [1, 1]} : vector<16x128xf32> to vector<16x8xf32>
    %64 = vector.extract_strided_slice %7 {offsets = [0, 56], sizes = [16, 8], strides = [1, 1]} : vector<16x128xf32> to vector<16x8xf32>
    %65 = vector.extract_strided_slice %7 {offsets = [0, 88], sizes = [16, 8], strides = [1, 1]} : vector<16x128xf32> to vector<16x8xf32>
    "tpu.trace_start"() <{level = 10 : i32, message = "td,sd->ts"}> : () -> ()
    %cst_21 = arith.constant dense<0.000000e+00> : vector<16x16xf32>
    %66 = tpu.matmul %63, %64, %cst_21 {dimension_numbers = #tpu.dot_dimension_numbers<[1], [1], [0], [0], [0, 0, 1, 0], [], []>, precision = #tpu.contract_precision<fp32>} : vector<16x8xf32>, vector<16x8xf32>, vector<16x16xf32> -> vector<16x16xf32>
    "tpu.trace_stop"() : () -> ()
    %67 = arith.addf %66, %17 : vector<16x16xf32>
    %cst_22 = arith.constant dense<0xFF800000> : vector<16xf32>
    %68 = vector.multi_reduction <maximumf>, %67, %cst_22 [1] : vector<16x16xf32> to vector<16xf32>
    %69 = vector.shape_cast %68 : vector<16xf32> to vector<16x1xf32>
    %70 = vector.broadcast %69 : vector<16x1xf32> to vector<16x16xf32>
    %71 = arith.subf %67, %70 : vector<16x16xf32>
    %72 = math.exp %71 : vector<16x16xf32>
    %cst_23 = arith.constant dense<0.000000e+00> : vector<16xf32>
    %73 = vector.multi_reduction <add>, %72, %cst_23 [1] : vector<16x16xf32> to vector<16xf32>
    %74 = vector.shape_cast %73 : vector<16xf32> to vector<16x1xf32>
    %75 = vector.broadcast %74 : vector<16x1xf32> to vector<16x16xf32>
    %76 = arith.divf %72, %75 : vector<16x16xf32>
    %cst_24 = arith.constant dense<0.000000e+00> : vector<16x8xf32>
    %77 = tpu.matmul %76, %65, %cst_24 {dimension_numbers = #tpu.dot_dimension_numbers<[1], [0], [0], [1], [0, 0, 1, 1], [], []>, precision = #tpu.contract_precision<fp32>} : vector<16x16xf32>, vector<16x8xf32>, vector<16x8xf32> -> vector<16x8xf32>
    %78 = tpu.concatenate %32, %47, %62, %77 in 1 : vector<16x8xf32>, vector<16x8xf32>, vector<16x8xf32>, vector<16x8xf32> -> vector<16x32xf32>
    %c1 = arith.constant 1 : index
    %c0_25 = arith.constant 0 : index
    %c0_26 = arith.constant 0 : index
    %79 = vector.load %arg1[%c1, %c0_25, %c0_26] : memref<2x32x128xf32, #tpu.memory_space<vmem>>, vector<1x32x128xf32>
    %80 = vector.shape_cast %79 : vector<1x32x128xf32> to vector<32x128xf32>
    %cst_27 = arith.constant dense<0.000000e+00> : vector<16x128xf32>
    %81 = tpu.matmul %78, %80, %cst_27 {dimension_numbers = #tpu.dot_dimension_numbers<[1], [0], [0], [1], [0, 0, 1, 1], [], []>, precision = #tpu.contract_precision<fp32>} : vector<16x32xf32>, vector<32x128xf32>, vector<16x128xf32> -> vector<16x128xf32>
    %c1_28 = arith.constant 1 : index
    %c0_29 = arith.constant 0 : index
    %c0_30 = arith.constant 0 : index
    %82 = vector.load %arg2[%c1_28, %c0_29, %c0_30] : memref<2x1x128xf32, #tpu.memory_space<vmem>>, vector<1x1x128xf32>
    %83 = vector.shape_cast %82 : vector<1x1x128xf32> to vector<1x128xf32>
    %84 = vector.broadcast %83 : vector<1x128xf32> to vector<16x128xf32>
    %85 = arith.addf %81, %84 : vector<16x128xf32>
    %c0_31 = arith.constant 0 : index
    %c0_32 = arith.constant 0 : index
    %86 = vector.load %arg3[%c0_31, %c0_32] : memref<16x128xf32, #tpu.memory_space<vmem>>, vector<16x128xf32>
    tpu.vector_store %arg3[%c0_31, %c0_32], %85 {strides = array<i32>} : memref<16x128xf32, #tpu.memory_space<vmem>>, vector<16x128xf32>,
    return
  }
}

</mosaic_0001>

<bundles_post_ra>
// kernel: tpu_custom_call.1
= control target key start
LH: loop header
LB: loop body
LE: loop exit
PB: predicated region body
PF: predicated region fallthrough
CT: control target
= control target key end

     0   :  { %8 = vsyncpa [#allocation3], 0  ;;  %s6826_s0 = inlined_call_operand.hbm [shape: f32[16,32], index: 0, kind: input, shape index: {}]   ;;  %s6827_s1 = inlined_call_operand.hbm [shape: f32[2,32,128], index: 1, kind: input, shape index: {}]   ;;  %s6828_s2 = inlined_call_operand.vmem [shape: f32[2,1,128], index: 2, kind: input, shape index: {}]   ;;  %s6829_s3 = inlined_call_operand.hbm [shape: f32[16,128], index: 3, kind: output, shape index: {}]  }
   0x1   :  { %9 = vsyncpa [#allocation6], 0 }
   0x2   :  { %10 = vsyncpa [#allocation4], 0  ;;  %s6272_s12 = smov [#allocation2]  }
   0x3   :  { %s16_s13 = sshll.u32 %s6272_s12, 4  ;;  %s17_s13 = int_to_ptr.vmem [resolvable:$true] %s16_s13 }
   0x4   :  { %s6214_s14 = scalar_lea.vmem %s17_s13, 256  ;;  %p6219_p1 = scmp.lt.s32.totalorder %s17_s13, %s17_s13 }
   0x5   :  { %p6215_p0 = scmp.ne.s32.totalorder %s17_s13, %s6214_s14  ;;  %p6220_p2 = scmp.lt.s32.totalorder %s6214_s14, %s6214_s14 }
   0x7   :  { %p6221_p3 = por %p6220_p2, %p6219_p1 }
   0x9   :  { %p6222_p4 = pnand %p6221_p3, %p6215_p0 }
   0xb   :  { %6225 = shalt.err (!%p6222_p4)
}
   0xc   :  { %s6273_s15 = smov 128   ;;  %s6274_s16 = smov 8  }
   0xd   :  { %22 = dma.hbm_to_vmem [thread:$0]  %s6826_s0, 256, %s17_s13, [#allocation3], %s6273_s15, %s6273_s15, %s6274_s16  }
   0xe   :  { %s6275_s19 = smov [#allocation5]  }
   0xf   :  { %s28_s20 = sshll.u32 %s6275_s19, 4  ;;  %s29_s20 = int_to_ptr.vmem [resolvable:$true] %s28_s20 }
  0x10   :  { %s6234_s21 = scalar_lea.vmem %s29_s20, 1024  ;;  %p6239_p6 = scmp.lt.s32.totalorder %s29_s20, %s29_s20 }
  0x11   :  { %p6235_p5 = scmp.ne.s32.totalorder %s29_s20, %s6234_s21  ;;  %p6240_p7 = scmp.lt.s32.totalorder %s6234_s21, %s6234_s21 }
  0x13   :  { %p6241_p8 = por %p6240_p7, %p6239_p6 }
  0x15   :  { %p6242_p9 = pnand %p6241_p8, %p6235_p5 }
  0x17   :  { %6245 = shalt.err (!%p6242_p9)
}
  0x18   :  { %34 = dma.hbm_to_vmem [thread:$0]  %s6827_s1, 1024, %s29_s20, [#allocation6], %s6273_s15, %s6273_s15, %s6274_s16  }
  0x19   :  { %6266 = dma.done.wait [#allocation3], 256  }
  0x1a   :  { %6267 = vsyncadd [#allocation3], 4294967040 }
  0x1b   :  { %6268 = dma.done.wait [#allocation6], 1024  }
  0x1c   :  { %6269 = vsyncadd [#allocation6], 4294966272  ;;  %vm56_vm0 = vcmask 261120   ;;  %v48_v0 = vld [vmem:[#allocation5 + $0x18] sm:$0xff]  ;;  %v47_v1 = vld [vmem:[#allocation5 + $0x10] sm:$0xff]  ;;  %s6276_s24 = smov 96  }
  0x1d   :  { %v46_v2 = vld [vmem:[#allocation5 + $0x8] sm:$0xff]  ;;  %v6323_v3 = vand.u32 4294901760, %v48_v0  ;;  %v6325_v4 = vand.u32 4294901760, %v47_v1  ;;  %v45_v6 = vld [vmem:[#allocation5] sm:$0xff]  ;;  %v43_v7 = vld [vmem:[#allocation2] sm:$0xff]  ;;  %vm612_vm1 = vcmask 64512  }
  0x1e   :  { %v6327_v5 = vand.u32 4294901760, %v46_v2  ;;  %v44_v8 = vld [vmem:[#allocation2 + $0x8] sm:$0xff]  ;;  %v6329_v9 = vand.u32 4294901760, %v45_v6  ;;  %v58_v10 = vsel %vm56_vm0, %v43_v7, 0  ;;  %v5420_v39 = vld [vmem:[%s6828_s2] ss:$0 sm:$0xff] }
  0x1f   :  { %v61_v11 = vsel %vm56_vm0, %v44_v8, 0  ;;  %5687 = vmatprep.subr.mxu0 %v6323_v3  ;;  %v178_v12 = vsub.f32 %v48_v0, %v6323_v3  ;;  %v6335_v13 = vand.u32 4294901760, %v58_v10  ;;  %v185_v14 = vsub.f32 %v47_v1, %v6325_v4  ;;  %s6278_s25 = smov 64   ;;  %s6279_s26 = smov 120  }
  0x20   :  { %v6338_v15 = vand.u32 4294901760, %v61_v11  ;;  %5688 = vmatpush3.msra.mxu0 %v6323_v3  ;;  %v192_v16 = vsub.f32 %v46_v2, %v6327_v5  ;;  %v199_v17 = vsub.f32 %v45_v6, %v6329_v9  ;;  %vm1123_vm6 = vcmask 130048   ;;  %s6280_s27 = smov 88   ;;  %s6281_s28 = smov 56  }
  0x21   :  { %5689 = vmatprep.subr.mxu0 %v6325_v4  ;;  %v179_v18 = vand.u32 4294901760, %v178_v12  ;;  %v133_v19 = vsub.f32 %v58_v10, %v6335_v13  ;;  %v186_v20 = vand.u32 4294901760, %v185_v14  ;;  %5706 = vmatprep.mubr.f32.mxu1 %v6335_v13  ;;  %s6282_s29 = smov 112   ;;  %s6283_s30 = smov 80   ;;  %vm4850_vm7 = vcmask 195584  }
  0x22   :  { %v143_v21 = vsub.f32 %v61_v11, %v6338_v15  ;;  %5690 = vmatpush3.msra.mxu0 %v6325_v4  ;;  %v193_v22 = vand.u32 4294901760, %v192_v16  ;;  %v200_v23 = vand.u32 4294901760, %v199_v17  ;;  %s6284_s4 = smov 48   ;;  %s6285_s5 = smov 72  }
  0x23   :  { %5691 = vmatprep.subr.mxu0 %v6327_v5  ;;  %v180_v24 = vsub.f32 %v178_v12, %v179_v18  ;;  %v134_v25 = vand.u32 4294901760, %v133_v19  ;;  %v187_v26 = vsub.f32 %v185_v14, %v186_v20  ;;  %s6286_s6 = smov 104   ;;  %s6287_s7 = smov 40  }
  0x24   :  { %v144_v27 = vand.u32 4294901760, %v143_v21  ;;  %5692 = vmatpush3.msra.mxu0 %v6327_v5  ;;  %v194_v28 = vsub.f32 %v192_v16, %v193_v22  ;;  %v201_v29 = vsub.f32 %v199_v17, %v200_v23  ;;  %s6288_s8 = smov 16   ;;  %s6289_s9 = smov 24  }
  0x25   :  { %5693 = vmatprep.subr.mxu0 %v6329_v9  ;;  %v181_v30 = vand.u32 4294901760, %v180_v24  ;;  %v135_v31 = vsub.f32 %v133_v19, %v134_v25  ;;  %v188_v32 = vand.u32 4294901760, %v187_v26 }
  0x26   :  { %v145_v33 = vsub.f32 %v143_v21, %v144_v27  ;;  %5694 = vmatpush3.msra.mxu0 %v6329_v9  ;;  %v195_v36 = vand.u32 4294901760, %v194_v28  ;;  %v202_v37 = vand.u32 4294901760, %v201_v29 }
  0x27   :  { %5698 = vmatprep.subr.mxu1 %v181_v30  ;;  %v136_v34 = vand.u32 4294901760, %v135_v31  ;;  %5709 = vmatprep.subr.mxu0 %v178_v12 }
  0x28   :  { %v146_v35 = vand.u32 4294901760, %v145_v33  ;;  %5699 = vmatpush3.msra.mxu1 %v181_v30 }
  0x29   :  { %5695 = vmatprep.mubr.f32.mxu0 %v136_v34  ;;  %5700 = vmatprep.subr.mxu1 %v188_v32 }
  0x2a   :  { %5696 = vmatmul.mubr.f32.vlgmr.msra.gmra.mxu0 %v146_v35  ;;  %5701 = vmatpush3.msra.mxu1 %v188_v32  ;;  %v6277_v32 = vmov -1e+30  }
  0x2b   :  { %5710 = vmatpush3.msra.mxu0 %v178_v12  ;;  %5702 = vmatprep.subr.mxu1 %v195_v36 }
  0x2c   :  { %5711 = vmatprep.subr.mxu0 %v185_v14  ;;  %5703 = vmatpush3.msra.mxu1 %v195_v36 }
  0x2d   :  { %5712 = vmatpush3.msra.mxu0 %v185_v14  ;;  %5704 = vmatprep.subr.mxu1 %v202_v37 }
  0x2e   :  { %5713 = vmatprep.subr.mxu0 %v192_v16  ;;  %5705 = vmatpush3.msra.mxu1 %v202_v37 }
  0x2f   :  { %5714 = vmatpush3.msra.mxu0 %v192_v16  ;;  %5707 = vmatmul.mubr.f32.vlgmr.msra.gmra.mxu1 %v6338_v15 }
  0x30   :  { %5715 = vmatprep.subr.mxu0 %v199_v17  ;;  %5720 = vmatprep.subr.mxu1 %v6323_v3 }
  0x31   :  { %5716 = vmatpush3.msra.mxu0 %v199_v17  ;;  %5717 = vmatprep.mubr.f32.mxu0 %v133_v19 }
  0x32   :  { %5721 = vmatpush3.msra.mxu1 %v6323_v3  ;;  %5718 = vmatmul.mubr.f32.vlgmr.msra.gmra.mxu0 %v143_v21 }
  0x33   :  { %5722 = vmatprep.subr.mxu1 %v6325_v4  ;;  %5731 = vmatprep.subr.mxu0 %v179_v18 }
  0x34   :  { %5723 = vmatpush3.msra.mxu1 %v6325_v4  ;;  %5732 = vmatpush3.msra.mxu0 %v179_v18 }
  0x35   :  { %5724 = vmatprep.subr.mxu1 %v6327_v5  ;;  %5733 = vmatprep.subr.mxu0 %v186_v20 }
  0x36   :  { %5725 = vmatpush3.msra.mxu1 %v6327_v5  ;;  %5734 = vmatpush3.msra.mxu0 %v186_v20 }
  0x37   :  { %5726 = vmatprep.subr.mxu1 %v6329_v9  ;;  %5735 = vmatprep.subr.mxu0 %v193_v22 }
  0x38   :  { %5727 = vmatpush3.msra.mxu1 %v6329_v9  ;;  %5728 = vmatprep.mubr.f32.mxu1 %v134_v25  ;;  %v591_v25 = vlaneseq }
  0x39   :  { %5736 = vmatpush3.msra.mxu0 %v193_v22  ;;  %5729 = vmatmul.mubr.f32.vlgmr.msra.gmra.mxu1 %v144_v27 }
  0x3a   :  { %5737 = vmatprep.subr.mxu0 %v200_v23  ;;  %5742 = vmatprep.subr.mxu1 %v6323_v3  ;;  %v592_v26 = vshrl.u32 %v591_v25, 7  ;;  %v595_v28 = vand.u32 127, %v591_v25 }
  0x3b   :  { %5738 = vmatpush3.msra.mxu0 %v200_v23  ;;  %5739 = vmatprep.mubr.f32.mxu0 %v6335_v13 }
  0x3c   :  { %5743 = vmatpush3.msra.mxu1 %v6323_v3  ;;  %5740 = vmatmul.mubr.f32.vlgmr.msra.gmra.mxu0 %v6338_v15  ;;  %v593_v27 = vadd.s32 8, %v592_v26  ;;  %vm596_vm4 = vcmp.le.s32.totalorder %v595_v28, %v592_v26 }
  0x3d   :  { %5744 = vmatprep.subr.mxu1 %v6325_v4  ;;  %5750 = vmatprep.mubr.f32.mxu1 %v6335_v13  ;;  %v6388_v33 = vsel %vm596_vm4, 0.0, %v6277_v32 }
  0x3e   :  { %5745 = vmatpush3.msra.mxu1 %v6325_v4  ;;  %v599_v29 = vand.u32 4294967288, %v593_v27  ;;  %vm597_vm2 = vcmp.le.s32.totalorder %v595_v28, %v593_v27 }
  0x3f   :  { %5746 = vmatprep.subr.mxu1 %v6327_v5 }
  0x40   :  { %5747 = vmatpush3.msra.mxu1 %v6327_v5  ;;  %vm601_vm3 = vcmp.ge.s32.totalorder %v595_v28, %v599_v29 }
  0x41   :  { %5748 = vmatprep.subr.mxu1 %v6329_v9  ;;  %vm603_vm5 = vmand %vm597_vm2, %vm601_vm3 }
  0x42   :  { %5749 = vmatpush3.msra.mxu1 %v6329_v9  ;;  %v6390_v35 = vsel %vm603_vm5, 0.0, %v6277_v32 }
  0x43   :  { %5751 = vmatmul.mubr.f32.vlgmr.msra.gmra.mxu1 %v6338_v15 }
  0xea   :  { %v5697_v38 = vpop.f32.mrf.mxu0 }
  0xeb   :  { %v149_v42 = vadd.f32 %v5697_v38, %v5420_v39 }
  0xec   :  { %v138_v40 = vpop.f32.mrf.mxu0 }
  0xed   :  { %v139_v43 = vadd.f32 %v5420_v39, %v138_v40 }
  0xef   :  { %v5708_v41 = vpop.f32.mrf.mxu1 }
  0xf0   :  { %v246_v46 = vadd.f32 %v5708_v41, %v149_v42 }
  0xf1   :  { %v239_v44 = vpop.f32.mrf.mxu1 }
  0xf2   :  { %v5719_v45 = vpop.f32.mrf.mxu0  ;;  %v240_v48 = vadd.f32 %v239_v44, %v139_v43 }
  0xf3   :  { %v333_v50 = vadd.f32 %v5719_v45, %v246_v46 }
  0xf4   :  { %v325_v49 = vpop.f32.mrf.mxu0 }
  0xf5   :  { %v326_v53 = vadd.f32 %v325_v49, %v240_v48 }
  0xf9   :  { %v5730_v47 = vpop.f32.mrf.mxu1 }
  0xfa   :  { %v418_v54 = vadd.f32 %v5730_v47, %v333_v50 }
  0xfb   :  { %v409_v51 = vpop.f32.mrf.mxu1 }
  0xfc   :  { %v5741_v52 = vpop.f32.mrf.mxu0  ;;  %v410_v55 = vadd.f32 %v409_v51, %v326_v53 }
  0xfd   :  { %v507_v57 = vadd.f32 %v5741_v52, %v418_v54 }
  0xfe   :  { %v500_v56 = vpop.f32.mrf.mxu0 }
  0xff   :  { %v501_v59 = vadd.f32 %v500_v56, %v410_v55 }
 0x103   :  { %v5752_v58 = vpop.f32.mrf.mxu1 }
 0x104   :  { %v6376_v60 = vadd.f32 %v5752_v58, %v507_v57 }
 0x105   :  { %v581_v61 = vpop.f32.mrf.mxu1 }
 0x106   :  { %v6378_v62 = vadd.f32 %v581_v61, %v501_v59  ;;  %610 = vrot.lane.b32.xlu0 %v6376_v60, %s6276_s24  ;;  %v615_v5 = vsel %vm612_vm1, %v6376_v60, 0 }
 0x107   :  { %v698_v6 = vand.u32 4294901760, %v615_v5 }
 0x108   :  { %v613_v63 = vsel %vm612_vm1, %v6378_v62, 0 }
 0x109   :  { %v688_v0 = vand.u32 4294901760, %v613_v63  ;;  %v699_v7 = vsub.f32 %v615_v5, %v698_v6 }
 0x10a   :  { %608 = vrot.lane.b32.xlu0 %v6378_v62, %s6276_s24 }
 0x10b   :  { %5764 = vmatprep.mubr.f32.mxu1 %v688_v0  ;;  %v689_v1 = vsub.f32 %v613_v63, %v688_v0  ;;  %v700_v11 = vand.u32 4294901760, %v699_v7 }
 0x10d   :  { %v690_v2 = vand.u32 4294901760, %v689_v1  ;;  %v701_v16 = vsub.f32 %v699_v7, %v700_v11 }
 0x10f   :  { %v691_v3 = vsub.f32 %v689_v1, %v690_v2  ;;  %v702_v20 = vand.u32 4294901760, %v701_v16 }
 0x111   :  { %v692_v4 = vand.u32 4294901760, %v691_v3 }
 0x113   :  { %5757 = vmatprep.mubr.f32.mxu0 %v692_v4 }
 0x178   :  { %v611_v8 = vpop.permute.xlu0 %610 }
 0x179   :  { %v619_v9 = vsel %vm612_vm1, %v611_v8, 0 }
 0x17a   :  { %v650_v10 = vand.u32 4294901760, %v619_v9 }
 0x17c   :  { %v738_v12 = vsub.f32 %v619_v9, %v650_v10  ;;  %5753 = vmatprep.subr.mxu0 %v650_v10  ;;  %v609_v13 = vpop.permute.xlu0 %608 }
 0x17d   :  { %v617_v14 = vsel %vm612_vm1, %v609_v13, 0  ;;  %5754 = vmatpush3.xpose.msra.mxu0 %v650_v10 }
 0x17e   :  { %v653_v15 = vand.u32 4294901760, %v617_v14  ;;  %v739_v17 = vand.u32 4294901760, %v738_v12 }
 0x180   :  { %v745_v18 = vsub.f32 %v617_v14, %v653_v15  ;;  %5755 = vmatprep.subr.mxu0 %v653_v15  ;;  %v740_v19 = vsub.f32 %v738_v12, %v739_v17 }
 0x181   :  { %5756 = vmatpush3.xpose.msra.mxu0 %v653_v15 }
 0x182   :  { %5767 = vmatprep.subr.mxu0 %v738_v12  ;;  %v741_v21 = vand.u32 4294901760, %v740_v19  ;;  %v746_v22 = vand.u32 4294901760, %v745_v18 }
 0x184   :  { %5758 = vmatmul.mubr.f32.vlgmr.msra.gmra.mxu0 %v702_v20  ;;  %5760 = vmatprep.subr.mxu1 %v741_v21  ;;  %v747_v23 = vsub.f32 %v745_v18, %v746_v22 }
 0x185   :  { %5761 = vmatpush3.xpose.msra.mxu1 %v741_v21  ;;  %5768 = vmatpush3.xpose.msra.mxu0 %v738_v12 }
 0x186   :  { %5771 = vmatprep.mubr.f32.mxu0 %v689_v1  ;;  %5769 = vmatprep.subr.mxu0 %v745_v18  ;;  %v748_v24 = vand.u32 4294901760, %v747_v23 }
 0x188   :  { %5762 = vmatprep.subr.mxu1 %v748_v24 }
 0x189   :  { %5763 = vmatpush3.xpose.msra.mxu1 %v748_v24  ;;  %5770 = vmatpush3.xpose.msra.mxu0 %v745_v18 }
 0x18a   :  { %5774 = vmatprep.subr.mxu1 %v650_v10  ;;  %5781 = vmatprep.subr.mxu0 %v739_v17 }
 0x18c   :  { %5765 = vmatmul.mubr.f32.vlgmr.msra.gmra.mxu1 %v698_v6  ;;  %5772 = vmatmul.mubr.f32.vlgmr.msra.gmra.mxu0 %v699_v7 }
 0x18d   :  { %5775 = vmatpush3.xpose.msra.mxu1 %v650_v10  ;;  %5778 = vmatprep.mubr.f32.mxu1 %v690_v2 }
 0x18e   :  { %5782 = vmatpush3.xpose.msra.mxu0 %v739_v17  ;;  %5785 = vmatprep.mubr.f32.mxu0 %v688_v0 }
 0x18f   :  { %5776 = vmatprep.subr.mxu1 %v653_v15  ;;  %5783 = vmatprep.subr.mxu0 %v746_v22 }
 0x191   :  { %5777 = vmatpush3.xpose.msra.mxu1 %v653_v15 }
 0x192   :  { %5784 = vmatpush3.xpose.msra.mxu0 %v746_v22  ;;  %5788 = vmatprep.subr.mxu1 %v650_v10 }
 0x194   :  { %5779 = vmatmul.mubr.f32.vlgmr.msra.gmra.mxu1 %v700_v11 }
 0x195   :  { %5786 = vmatmul.mubr.f32.vlgmr.msra.gmra.mxu0 %v698_v6  ;;  %5789 = vmatpush3.xpose.msra.mxu1 %v650_v10 }
 0x196   :  { %5792 = vmatprep.mubr.f32.mxu1 %v688_v0  ;;  %5790 = vmatprep.subr.mxu1 %v653_v15 }
 0x199   :  { %5791 = vmatpush3.xpose.msra.mxu1 %v653_v15 }
 0x19c   :  { %5793 = vmatmul.mubr.f32.vlgmr.msra.gmra.mxu1 %v698_v6 }
 0x244   :  { %v5759_v30 = vpop.f32.mrf.mxu0 }
 0x245   :  { %v705_v39 = vadd.f32 %v5759_v30, %v6390_v35 }
 0x246   :  { %v694_v34 = vpop.f32.mrf.mxu0 }
 0x247   :  { %v695_v37 = vadd.f32 %v694_v34, %v6388_v33 }
 0x24c   :  { %v5766_v31 = vpop.f32.mrf.mxu1  ;;  %v5773_v38 = vpop.f32.mrf.mxu0 }
 0x24d   :  { %v792_v42 = vadd.f32 %v5766_v31, %v705_v39 }
 0x24e   :  { %v785_v36 = vpop.f32.mrf.mxu1  ;;  %v867_v43 = vpop.f32.mrf.mxu0 }
 0x24f   :  { %v786_v40 = vadd.f32 %v785_v36, %v695_v37  ;;  %v875_v47 = vadd.f32 %v5773_v38, %v792_v42 }
 0x251   :  { %v868_v45 = vadd.f32 %v867_v43, %v786_v40 }
 0x254   :  { %v5780_v41 = vpop.f32.mrf.mxu1 }
 0x255   :  { %v5787_v46 = vpop.f32.mrf.mxu0  ;;  %v958_v49 = vadd.f32 %v5780_v41, %v875_v47 }
 0x256   :  { %v949_v44 = vpop.f32.mrf.mxu1 }
 0x257   :  { %v950_v48 = vadd.f32 %v949_v44, %v868_v45  ;;  %v1034_v50 = vpop.f32.mrf.mxu0  ;;  %v1041_v54 = vadd.f32 %v5787_v46, %v958_v49 }
 0x259   :  { %v1035_v52 = vadd.f32 %v1034_v50, %v950_v48 }
 0x25c   :  { %v5794_v51 = vpop.f32.mrf.mxu1 }
 0x25d   :  { %v1120_v56 = vadd.f32 %v5794_v51, %v1041_v54 }
 0x25e   :  { %v1113_v53 = vpop.f32.mrf.mxu1 }
 0x25f   :  { %v1114_v55 = vadd.f32 %v1113_v53, %v1035_v52  ;;  %v1127_v58 = vsel %vm1123_vm6, %v1120_v56, -inf }
 0x261   :  { %v1124_v57 = vsel %vm1123_vm6, %v1114_v55, -inf }
 0x262   :  { %1125 = vmax.xlane.f32.xlu1 %v1124_v57 }
 0x266   :  { %1128 = vmax.xlane.f32.xlu1 %v1127_v58 }
 0x2eb   :  { %v1126_v59 = vpop.xlane.xlu1 %1125 }
 0x2ec   :  { %v1130_v61 = vsub.f32 %v1114_v55, %v1126_v59 }
 0x2ee   :  { %v1132_v63 = vmul.f32 1.442695, %v1130_v61 }
 0x2ef   :  { %v1129_v0 = vpop.xlane.xlu1 %1128 }
 0x2f0   :  { %6174 = vpow2.f32 %v1132_v63  ;;  %v1131_v1 = vsub.f32 %v1120_v56, %v1129_v0 }
 0x2f2   :  { %v1134_v2 = vmul.f32 1.442695, %v1131_v1 }
 0x2f4   :  { %6176 = vpow2.f32 %v1134_v2 }
 0x2fd   :  { %v6175_v3 = vpop.eup %6174 }
 0x2fe   :  { %v1136_v4 = vsel %vm1123_vm6, %v6175_v3, 0.0 }
 0x2ff   :  { %1137 = vadd.xlane.f32.xlu0 %v1136_v4 }
 0x301   :  { %v6177_v5 = vpop.eup %6176 }
 0x302   :  { %v1139_v6 = vsel %vm1123_vm6, %v6177_v5, 0.0 }
 0x303   :  { %1140 = vadd.xlane.f32.xlu1 %v1139_v6 }
 0x314   :  { %1148 = vrot.lane.b32.xlu1 %v6376_v60, %s6278_s25 }
 0x315   :  { %1660 = vrot.lane.b32.xlu0 %v6378_v62, %s6279_s26 }
 0x318   :  { %1146 = vrot.lane.b32.xlu1 %v6378_v62, %s6278_s25 }
 0x31c   :  { %1666 = vrot.lane.b32.xlu1 %v6376_v60, %s6280_s27 }
 0x320   :  { %1664 = vrot.lane.b32.xlu1 %v6378_v62, %s6280_s27 }
 0x324   :  { %1662 = vrot.lane.b32.xlu1 %v6376_v60, %s6279_s26 }
 0x388   :  { %v1138_v7 = vpop.xlane.xlu0 %1137 }
 0x389   :  { %6178 = vrcp.f32 %v1138_v7 }
 0x38c   :  { %v1141_v8 = vpop.xlane.xlu1 %1140  ;;  %v1661_v27 = vpop.permute.xlu0 %1660 }
 0x38d   :  { %6180 = vrcp.f32 %v1141_v8  ;;  %v1668_v38 = vsel %vm612_vm1, %v1661_v27, 0 }
 0x38e   :  { %v6443_v45 = vand.u32 4294901760, %v1668_v38 }
 0x390   :  { %v1149_v9 = vpop.permute.xlu1 %1148  ;;  %v1744_v52 = vsub.f32 %v1668_v38, %v6443_v45 }
 0x391   :  { %v1187_v10 = vand.u32 4294901760, %v1149_v9 }
 0x392   :  { %v1745_v58 = vand.u32 4294901760, %v1744_v52 }
 0x393   :  { %v6404_v11 = vsub.f32 %v1149_v9, %v1187_v10  ;;  %5795 = vmatprep.subr.mxu0 %v1187_v10 }
 0x394   :  { %5796 = vmatpush3.msra.mxu0 %v1187_v10  ;;  %v1147_v12 = vpop.permute.xlu1 %1146  ;;  %v1746_v0 = vsub.f32 %v1744_v52, %v1745_v58 }
 0x395   :  { %v6406_v13 = vand.u32 4294901760, %v1147_v12  ;;  %v6409_v14 = vand.u32 4294901760, %v6404_v11 }
 0x396   :  { %v6179_v15 = vpop.eup %6178  ;;  %v1747_v2 = vand.u32 4294901760, %v1746_v0 }
 0x397   :  { %v6412_v16 = vsub.f32 %v1147_v12, %v6406_v13  ;;  %5797 = vmatprep.subr.mxu0 %v6406_v13  ;;  %v1277_v17 = vsub.f32 %v6404_v11, %v6409_v14  ;;  %v1143_v18 = vmul.f32 %v6179_v15, %v6175_v3 }
 0x398   :  { %5798 = vmatpush3.msra.mxu0 %v6406_v13  ;;  %v1667_v19 = vpop.permute.xlu1 %1666 }
 0x399   :  { %v1674_v20 = vsel %vm612_vm1, %v1667_v19, 0  ;;  %5809 = vmatprep.subr.mxu0 %v6404_v11  ;;  %v1278_v21 = vand.u32 4294901760, %v1277_v17  ;;  %v1153_v22 = vsel %vm1123_vm6, %v1143_v18, 0  ;;  %v6422_v23 = vand.u32 4294901760, %v6412_v16 }
 0x39a   :  { %v6181_v24 = vpop.eup %6180  ;;  %v6424_v25 = vand.u32 4294901760, %v1674_v20  ;;  %v6426_v26 = vand.u32 4294901760, %v1153_v22 }
 0x39b   :  { %5802 = vmatprep.subr.mxu1 %v1278_v21  ;;  %v1284_v28 = vsub.f32 %v6412_v16, %v6422_v23  ;;  %v1145_v29 = vmul.f32 %v6181_v24, %v6177_v5 }
 0x39c   :  { %5803 = vmatpush3.msra.mxu1 %v1278_v21  ;;  %5806 = vmatprep.mubr.f32.mxu1 %v6426_v26  ;;  %v1665_v30 = vpop.permute.xlu1 %1664  ;;  %v1226_v31 = vsub.f32 %v1153_v22, %v6426_v26  ;;  %v6433_v32 = vsub.f32 %v1674_v20, %v6424_v25 }
 0x39d   :  { %v1672_v34 = vsel %vm612_vm1, %v1665_v30, 0  ;;  %v1285_v36 = vand.u32 4294901760, %v1284_v28  ;;  %v1156_v37 = vsel %vm1123_vm6, %v1145_v29, 0 }
 0x39e   :  { %v6438_v39 = vand.u32 4294901760, %v1672_v34  ;;  %v1235_v40 = vand.u32 4294901760, %v1156_v37  ;;  %v1227_v41 = vand.u32 4294901760, %v1226_v31  ;;  %v6446_v46 = vand.u32 4294901760, %v6433_v32 }
 0x39f   :  { %5804 = vmatprep.subr.mxu1 %v1285_v36 }
 0x3a0   :  { %v6441_v42 = vsub.f32 %v1672_v34, %v6438_v39  ;;  %5805 = vmatpush3.msra.mxu1 %v1285_v36  ;;  %v1236_v43 = vsub.f32 %v1156_v37, %v1235_v40  ;;  %v1228_v44 = vsub.f32 %v1226_v31, %v1227_v41  ;;  %v1663_v47 = vpop.permute.xlu1 %1662  ;;  %v1795_v54 = vsub.f32 %v6433_v32, %v6446_v46 }
 0x3a1   :  { %5807 = vmatmul.mubr.f32.vlgmr.msra.gmra.mxu1 %v1235_v40  ;;  %5816 = vmatprep.subr.mxu1 %v1187_v10  ;;  %v1670_v53 = vsel %vm612_vm1, %v1663_v47, 0 }
 0x3a2   :  { %5817 = vmatpush3.msra.mxu1 %v1187_v10  ;;  %5820 = vmatprep.mubr.f32.mxu1 %v1227_v41  ;;  %v1229_v48 = vand.u32 4294901760, %v1228_v44  ;;  %v1237_v49 = vand.u32 4294901760, %v1236_v43  ;;  %v6450_v50 = vand.u32 4294901760, %v6441_v42  ;;  %v1753_v57 = vand.u32 4294901760, %v1670_v53 }
 0x3a3   :  { %5818 = vmatprep.subr.mxu1 %v6406_v13  ;;  %v1796_v59 = vand.u32 4294901760, %v1795_v54 }
 0x3a4   :  { %5799 = vmatprep.mubr.f32.mxu0 %v1229_v48  ;;  %5819 = vmatpush3.msra.mxu1 %v6406_v13  ;;  %v1238_v51 = vsub.f32 %v1236_v43, %v1237_v49  ;;  %v1802_v56 = vsub.f32 %v6441_v42, %v6450_v50  ;;  %v1754_v63 = vsub.f32 %v1670_v53, %v1753_v57 }
 0x3a5   :  { %5821 = vmatmul.mubr.f32.vlgmr.msra.gmra.mxu1 %v1237_v49  ;;  %5830 = vmatprep.subr.mxu1 %v1187_v10 }
 0x3a6   :  { %5831 = vmatpush3.msra.mxu1 %v1187_v10  ;;  %5834 = vmatprep.mubr.f32.mxu1 %v6426_v26  ;;  %v1239_v55 = vand.u32 4294901760, %v1238_v51  ;;  %v1803_v61 = vand.u32 4294901760, %v1802_v56  ;;  %v1755_v1 = vand.u32 4294901760, %v1754_v63 }
 0x3a7   :  { %5832 = vmatprep.subr.mxu1 %v6406_v13 }
 0x3a8   :  { %5800 = vmatmul.mubr.f32.vlgmr.msra.gmra.mxu0 %v1239_v55  ;;  %5833 = vmatpush3.msra.mxu1 %v6406_v13  ;;  %v1756_v3 = vsub.f32 %v1754_v63, %v1755_v1 }
 0x3a9   :  { %5810 = vmatpush3.msra.mxu0 %v6404_v11  ;;  %5813 = vmatprep.mubr.f32.mxu0 %v1226_v31 }
 0x3aa   :  { %5811 = vmatprep.subr.mxu0 %v6412_v16  ;;  %5835 = vmatmul.mubr.f32.vlgmr.msra.gmra.mxu1 %v1235_v40  ;;  %v1757_v4 = vand.u32 4294901760, %v1756_v3 }
 0x3ab   :  { %5844 = vmatprep.subr.mxu1 %v1796_v59  ;;  %5812 = vmatpush3.msra.mxu0 %v6412_v16 }
 0x3ac   :  { %5845 = vmatpush3.xpose.msra.mxu1 %v1796_v59  ;;  %5848 = vmatprep.mubr.f32.mxu1 %v6443_v45 }
 0x3ad   :  { %5823 = vmatprep.subr.mxu0 %v6409_v14  ;;  %5846 = vmatprep.subr.mxu1 %v1803_v61 }
 0x3ae   :  { %5814 = vmatmul.mubr.f32.vlgmr.msra.gmra.mxu0 %v1236_v43 }
 0x3af   :  { %5824 = vmatpush3.msra.mxu0 %v6409_v14  ;;  %5827 = vmatprep.mubr.f32.mxu0 %v6426_v26 }
 0x3b0   :  { %5825 = vmatprep.subr.mxu0 %v6422_v23  ;;  %5847 = vmatpush3.xpose.msra.mxu1 %v1803_v61 }
 0x3b1   :  { %5826 = vmatpush3.msra.mxu0 %v6422_v23  ;;  %5858 = vmatprep.subr.mxu1 %v6424_v25 }
 0x3b2   :  { %5837 = vmatprep.subr.mxu0 %v6424_v25  ;;  %5828 = vmatmul.mubr.f32.vlgmr.msra.gmra.mxu0 %v1235_v40 }
 0x3b3   :  { %5838 = vmatpush3.xpose.msra.mxu0 %v6424_v25  ;;  %5841 = vmatprep.mubr.f32.mxu0 %v1747_v2 }
 0x3b4   :  { %5839 = vmatprep.subr.mxu0 %v6438_v39  ;;  %5849 = vmatmul.mubr.f32.vlgmr.msra.gmra.mxu1 %v1753_v57 }
 0x3b5   :  { %5859 = vmatpush3.xpose.msra.mxu1 %v6424_v25  ;;  %5862 = vmatprep.mubr.f32.mxu1 %v1745_v58 }
 0x3b6   :  { %5860 = vmatprep.subr.mxu1 %v6438_v39 }
 0x3b7   :  { %5840 = vmatpush3.xpose.msra.mxu0 %v6438_v39 }
 0x3b8   :  { %5851 = vmatprep.subr.mxu0 %v6433_v32 }
 0x3b9   :  { %5861 = vmatpush3.xpose.msra.mxu1 %v6438_v39 }
 0x3ba   :  { %5842 = vmatmul.mubr.f32.vlgmr.msra.gmra.mxu0 %v1757_v4  ;;  %5872 = vmatprep.subr.mxu1 %v6424_v25 }
 0x3bb   :  { %5852 = vmatpush3.xpose.msra.mxu0 %v6433_v32  ;;  %5855 = vmatprep.mubr.f32.mxu0 %v1744_v52 }
 0x3bc   :  { %5853 = vmatprep.subr.mxu0 %v6441_v42  ;;  %5863 = vmatmul.mubr.f32.vlgmr.msra.gmra.mxu1 %v1755_v1 }
 0x3bd   :  { %5873 = vmatpush3.xpose.msra.mxu1 %v6424_v25  ;;  %5876 = vmatprep.mubr.f32.mxu1 %v6443_v45 }
 0x3be   :  { %5874 = vmatprep.subr.mxu1 %v6438_v39 }
 0x3bf   :  { %5854 = vmatpush3.xpose.msra.mxu0 %v6441_v42 }
 0x3c0   :  { %5865 = vmatprep.subr.mxu0 %v6446_v46 }
 0x3c1   :  { %5875 = vmatpush3.xpose.msra.mxu1 %v6438_v39 }
 0x3c2   :  { %5856 = vmatmul.mubr.f32.vlgmr.msra.gmra.mxu0 %v1754_v63 }
 0x3c3   :  { %5866 = vmatpush3.xpose.msra.mxu0 %v6446_v46  ;;  %5869 = vmatprep.mubr.f32.mxu0 %v6443_v45 }
 0x3c4   :  { %5867 = vmatprep.subr.mxu0 %v6450_v50  ;;  %5877 = vmatmul.mubr.f32.vlgmr.msra.gmra.mxu1 %v1753_v57 }
 0x3c7   :  { %5868 = vmatpush3.xpose.msra.mxu0 %v6450_v50 }
 0x3ca   :  { %5870 = vmatmul.mubr.f32.vlgmr.msra.gmra.mxu0 %v1753_v57 }
 0x461   :  { %v5808_v5 = vpop.f32.mrf.mxu1 }
 0x463   :  { %v1322_v6 = vpop.f32.mrf.mxu1 }
 0x465   :  { %v5822_v9 = vpop.f32.mrf.mxu1 }
 0x467   :  { %v1486_v12 = vpop.f32.mrf.mxu1 }
 0x468   :  { %v5801_v7 = vpop.f32.mrf.mxu0 }
 0x469   :  { %v1329_v8 = vadd.f32 %v5808_v5, %v5801_v7 }
 0x46a   :  { %v1231_v10 = vpop.f32.mrf.mxu0  ;;  %v5836_v18 = vpop.f32.mrf.mxu1 }
 0x46b   :  { %v1323_v11 = vadd.f32 %v1322_v6, %v1231_v10 }
 0x46c   :  { %v1650_v25 = vpop.f32.mrf.mxu1 }
 0x46e   :  { %v5815_v13 = vpop.f32.mrf.mxu0 }
 0x46f   :  { %v1412_v14 = vadd.f32 %v5815_v13, %v1329_v8 }
 0x470   :  { %v1404_v15 = vpop.f32.mrf.mxu0 }
 0x471   :  { %v1405_v16 = vadd.f32 %v1404_v15, %v1323_v11  ;;  %v1495_v17 = vadd.f32 %v5822_v9, %v1412_v14 }
 0x472   :  { %v5829_v19 = vpop.f32.mrf.mxu0 }
 0x473   :  { %v1578_v20 = vadd.f32 %v5829_v19, %v1495_v17  ;;  %v1487_v21 = vadd.f32 %v1486_v12, %v1405_v16 }
 0x474   :  { %v1571_v22 = vpop.f32.mrf.mxu0  ;;  %v5850_v28 = vpop.f32.mrf.mxu1 }
 0x475   :  { %v6493_v23 = vadd.f32 %v5836_v18, %v1578_v20  ;;  %v1572_v24 = vadd.f32 %v1571_v22, %v1487_v21 }
 0x476   :  { %v1840_v32 = vpop.f32.mrf.mxu1 }
 0x477   :  { %v6495_v26 = vadd.f32 %v1650_v25, %v1572_v24 }
 0x47a   :  { %v5843_v27 = vpop.f32.mrf.mxu0 }
 0x47b   :  { %v1760_v30 = vadd.f32 %v5843_v27, %v6390_v35 }
 0x47c   :  { %v1749_v29 = vpop.f32.mrf.mxu0  ;;  %v5864_v37 = vpop.f32.mrf.mxu1 }
 0x47d   :  { %v1750_v31 = vadd.f32 %v1749_v29, %v6388_v33  ;;  %v1847_v36 = vadd.f32 %v5850_v28, %v1760_v30 }
 0x47e   :  { %v2004_v42 = vpop.f32.mrf.mxu1 }
 0x47f   :  { %v1841_v40 = vadd.f32 %v1840_v32, %v1750_v31 }
 0x482   :  { %v5857_v34 = vpop.f32.mrf.mxu0 }
 0x483   :  { %v1930_v39 = vadd.f32 %v5857_v34, %v1847_v36 }
 0x484   :  { %v1922_v38 = vpop.f32.mrf.mxu0  ;;  %v5878_v44 = vpop.f32.mrf.mxu1 }
 0x485   :  { %v1923_v41 = vadd.f32 %v1922_v38, %v1841_v40  ;;  %v2013_v43 = vadd.f32 %v5864_v37, %v1930_v39 }
 0x486   :  { %v2168_v51 = vpop.f32.mrf.mxu1 }
 0x487   :  { %v2005_v47 = vadd.f32 %v2004_v42, %v1923_v41 }
 0x48a   :  { %v5871_v45 = vpop.f32.mrf.mxu0 }
 0x48b   :  { %v2096_v46 = vadd.f32 %v5871_v45, %v2013_v43 }
 0x48c   :  { %v2089_v48 = vpop.f32.mrf.mxu0 }
 0x48d   :  { %v2090_v49 = vadd.f32 %v2089_v48, %v2005_v47  ;;  %v2175_v50 = vadd.f32 %v5878_v44, %v2096_v46 }
 0x48f   :  { %v2181_v52 = vsel %vm1123_vm6, %v2175_v50, -inf  ;;  %v2169_v53 = vadd.f32 %v2168_v51, %v2090_v49 }
 0x490   :  { %2182 = vmax.xlane.f32.xlu0 %v2181_v52 }
 0x491   :  { %v2178_v54 = vsel %vm1123_vm6, %v2169_v53, -inf }
 0x492   :  { %2179 = vmax.xlane.f32.xlu1 %v2178_v54 }
 0x4a6   :  { %2200 = vrot.lane.b32.xlu0 %v6378_v62, %s6281_s28 }
 0x4aa   :  { %2714 = vrot.lane.b32.xlu0 %v6378_v62, %s6282_s29 }
 0x519   :  { %v2183_v55 = vpop.xlane.xlu0 %2182 }
 0x51a   :  { %v2185_v56 = vsub.f32 %v2175_v50, %v2183_v55 }
 0x51b   :  { %v2180_v57 = vpop.xlane.xlu1 %2179 }
 0x51c   :  { %v2188_v58 = vmul.f32 1.442695, %v2185_v56  ;;  %v2184_v59 = vsub.f32 %v2169_v53, %v2180_v57 }
 0x51d   :  { %v2201_v3 = vpop.permute.xlu0 %2200 }
 0x51e   :  { %6182 = vpow2.f32 %v2188_v58  ;;  %v2186_v61 = vmul.f32 1.442695, %v2184_v59  ;;  %v6509_v5 = vand.u32 4294901760, %v2201_v3 }
 0x520   :  { %6184 = vpow2.f32 %v2186_v61  ;;  %v6512_v7 = vsub.f32 %v2201_v3, %v6509_v5 }
 0x521   :  { %v2715_v34 = vpop.permute.xlu0 %2714 }
 0x522   :  { %v6517_v11 = vand.u32 4294901760, %v6512_v7  ;;  %v2722_v41 = vsel %vm612_vm1, %v2715_v34, 0 }
 0x523   :  { %v6554_v45 = vand.u32 4294901760, %v2722_v41 }
 0x524   :  { %v2338_v18 = vsub.f32 %v6512_v7, %v6517_v11 }
 0x525   :  { %v2798_v53 = vsub.f32 %v2722_v41, %v6554_v45 }
 0x526   :  { %v2339_v30 = vand.u32 4294901760, %v2338_v18 }
 0x527   :  { %v2799_v58 = vand.u32 4294901760, %v2798_v53 }
 0x529   :  { %v2800_v61 = vsub.f32 %v2798_v53, %v2799_v58 }
 0x52b   :  { %v6183_v63 = vpop.eup %6182 }
 0x52c   :  { %v2193_v0 = vsel %vm1123_vm6, %v6183_v63, 0.0 }
 0x52d   :  { %v6185_v1 = vpop.eup %6184  ;;  %2194 = vadd.xlane.f32.xlu1 %v2193_v0  ;;  %v2801_v0 = vand.u32 4294901760, %v2800_v61 }
 0x52e   :  { %v2190_v2 = vsel %vm1123_vm6, %v6185_v1, 0.0 }
 0x531   :  { %2191 = vadd.xlane.f32.xlu1 %v2190_v2 }
 0x542   :  { %2202 = vrot.lane.b32.xlu1 %v6376_v60, %s6281_s28 }
 0x546   :  { %2720 = vrot.lane.b32.xlu1 %v6376_v60, %s6283_s30 }
 0x54a   :  { %2718 = vrot.lane.b32.xlu1 %v6378_v62, %s6283_s30 }
 0x54e   :  { %2716 = vrot.lane.b32.xlu1 %v6376_v60, %s6282_s29 }
 0x5b6   :  { %v2195_v4 = vpop.xlane.xlu1 %2194 }
 0x5b7   :  { %6186 = vrcp.f32 %v2195_v4 }
 0x5ba   :  { %v2192_v6 = vpop.xlane.xlu1 %2191 }
 0x5bb   :  { %6188 = vrcp.f32 %v2192_v6 }
 0x5be   :  { %v2203_v8 = vpop.permute.xlu1 %2202 }
 0x5bf   :  { %v2241_v9 = vand.u32 4294901760, %v2203_v8 }
 0x5c1   :  { %v6514_v10 = vsub.f32 %v2203_v8, %v2241_v9  ;;  %5879 = vmatprep.subr.mxu0 %v2241_v9 }
 0x5c2   :  { %5880 = vmatpush3.msra.mxu0 %v2241_v9  ;;  %v2721_v12 = vpop.permute.xlu1 %2720 }
 0x5c3   :  { %v2728_v13 = vsel %vm612_vm1, %v2721_v12, 0  ;;  %5881 = vmatprep.subr.mxu0 %v6509_v5  ;;  %v6522_v14 = vand.u32 4294901760, %v6514_v10 }
 0x5c4   :  { %v6187_v15 = vpop.eup %6186  ;;  %5882 = vmatpush3.msra.mxu0 %v6509_v5  ;;  %v6525_v16 = vand.u32 4294901760, %v2728_v13 }
 0x5c5   :  { %5893 = vmatprep.subr.mxu0 %v6514_v10  ;;  %v2331_v17 = vsub.f32 %v6514_v10, %v6522_v14  ;;  %v2199_v19 = vmul.f32 %v6187_v15, %v6183_v63 }
 0x5c6   :  { %v2719_v20 = vpop.permute.xlu1 %2718  ;;  %v6539_v29 = vsub.f32 %v2728_v13, %v6525_v16 }
 0x5c7   :  { %v2726_v21 = vsel %vm612_vm1, %v2719_v20, 0  ;;  %v2332_v22 = vand.u32 4294901760, %v2331_v17  ;;  %v2210_v24 = vsel %vm1123_vm6, %v2199_v19, 0 }
 0x5c8   :  { %v6189_v25 = vpop.eup %6188  ;;  %v6534_v27 = vand.u32 4294901760, %v2726_v21  ;;  %v6536_v28 = vand.u32 4294901760, %v2210_v24  ;;  %v6547_v40 = vand.u32 4294901760, %v6539_v29 }
 0x5c9   :  { %5886 = vmatprep.subr.mxu1 %v2332_v22  ;;  %v2197_v31 = vmul.f32 %v6189_v25, %v6185_v1 }
 0x5ca   :  { %5887 = vmatpush3.msra.mxu1 %v2332_v22  ;;  %v2290_v32 = vsub.f32 %v2210_v24, %v6536_v28  ;;  %v6544_v37 = vsub.f32 %v2726_v21, %v6534_v27  ;;  %v2717_v46 = vpop.permute.xlu1 %2716  ;;  %v2849_v47 = vsub.f32 %v6539_v29, %v6547_v40 }
 0x5cb   :  { %5888 = vmatprep.subr.mxu1 %v2339_v30  ;;  %v2207_v36 = vsel %vm1123_vm6, %v2197_v31, 0  ;;  %v2724_v50 = vsel %vm612_vm1, %v2717_v46, 0 }
 0x5cc   :  { %5889 = vmatpush3.msra.mxu1 %v2339_v30  ;;  %v2279_v38 = vand.u32 4294901760, %v2207_v36  ;;  %v2291_v39 = vand.u32 4294901760, %v2290_v32  ;;  %v6552_v44 = vand.u32 4294901760, %v6544_v37  ;;  %v2850_v54 = vand.u32 4294901760, %v2849_v47 }
 0x5cd   :  { %5900 = vmatprep.subr.mxu1 %v2241_v9  ;;  %v2807_v56 = vand.u32 4294901760, %v2724_v50 }
 0x5ce   :  { %5890 = vmatprep.mubr.f32.mxu1 %v2279_v38  ;;  %v2280_v42 = vsub.f32 %v2207_v36, %v2279_v38  ;;  %v2292_v48 = vsub.f32 %v2290_v32, %v2291_v39  ;;  %v2856_v52 = vsub.f32 %v6544_v37, %v6552_v44 }
 0x5cf   :  { %5891 = vmatmul.mubr.f32.vlgmr.msra.gmra.mxu1 %v6536_v28  ;;  %v2808_v59 = vsub.f32 %v2724_v50, %v2807_v56 }
 0x5d0   :  { %5901 = vmatpush3.msra.mxu1 %v2241_v9  ;;  %v2281_v43 = vand.u32 4294901760, %v2280_v42  ;;  %v2293_v55 = vand.u32 4294901760, %v2292_v48  ;;  %v2857_v57 = vand.u32 4294901760, %v2856_v52 }
 0x5d1   :  { %5902 = vmatprep.subr.mxu1 %v6509_v5  ;;  %v2809_v63 = vand.u32 4294901760, %v2808_v59 }
 0x5d2   :  { %5903 = vmatpush3.msra.mxu1 %v6509_v5  ;;  %5904 = vmatprep.mubr.f32.mxu1 %v2281_v43  ;;  %v2282_v49 = vsub.f32 %v2280_v42, %v2281_v43 }
 0x5d3   :  { %5914 = vmatprep.subr.mxu1 %v2241_v9  ;;  %5905 = vmatmul.mubr.f32.vlgmr.msra.gmra.mxu1 %v2291_v39  ;;  %v2810_v1 = vsub.f32 %v2808_v59, %v2809_v63 }
 0x5d4   :  { %5915 = vmatpush3.msra.mxu1 %v2241_v9  ;;  %5918 = vmatprep.mubr.f32.mxu1 %v2279_v38  ;;  %v2283_v51 = vand.u32 4294901760, %v2282_v49 }
 0x5d5   :  { %5916 = vmatprep.subr.mxu1 %v6509_v5  ;;  %v2811_v2 = vand.u32 4294901760, %v2810_v1 }
 0x5d6   :  { %5917 = vmatpush3.msra.mxu1 %v6509_v5  ;;  %5883 = vmatprep.mubr.f32.mxu0 %v2283_v51 }
 0x5d7   :  { %5928 = vmatprep.subr.mxu1 %v2850_v54  ;;  %5884 = vmatmul.mubr.f32.vlgmr.msra.gmra.mxu0 %v2293_v55 }
 0x5d8   :  { %5894 = vmatpush3.msra.mxu0 %v6514_v10  ;;  %5919 = vmatmul.mubr.f32.vlgmr.msra.gmra.mxu1 %v6536_v28 }
 0x5d9   :  { %5929 = vmatpush3.xpose.msra.mxu1 %v2850_v54  ;;  %5895 = vmatprep.subr.mxu0 %v6512_v7 }
 0x5da   :  { %5897 = vmatprep.mubr.f32.mxu0 %v2280_v42  ;;  %5930 = vmatprep.subr.mxu1 %v2857_v57 }
 0x5db   :  { %5932 = vmatprep.mubr.f32.mxu1 %v6554_v45  ;;  %5896 = vmatpush3.msra.mxu0 %v6512_v7 }
 0x5dc   :  { %5907 = vmatprep.subr.mxu0 %v6522_v14  ;;  %5898 = vmatmul.mubr.f32.vlgmr.msra.gmra.mxu0 %v2290_v32 }
 0x5dd   :  { %5908 = vmatpush3.msra.mxu0 %v6522_v14  ;;  %5931 = vmatpush3.xpose.msra.mxu1 %v2857_v57 }
 0x5de   :  { %5909 = vmatprep.subr.mxu0 %v6517_v11  ;;  %5911 = vmatprep.mubr.f32.mxu0 %v2279_v38 }
 0x5df   :  { %5942 = vmatprep.subr.mxu1 %v6525_v16  ;;  %5910 = vmatpush3.msra.mxu0 %v6517_v11 }
 0x5e0   :  { %5921 = vmatprep.subr.mxu0 %v6525_v16  ;;  %5933 = vmatmul.mubr.f32.vlgmr.msra.gmra.mxu1 %v2807_v56 }
 0x5e1   :  { %5912 = vmatmul.mubr.f32.vlgmr.msra.gmra.mxu0 %v6536_v28  ;;  %5943 = vmatpush3.xpose.msra.mxu1 %v6525_v16 }
 0x5e2   :  { %5922 = vmatpush3.xpose.msra.mxu0 %v6525_v16  ;;  %5946 = vmatprep.mubr.f32.mxu1 %v2799_v58 }
 0x5e3   :  { %5923 = vmatprep.subr.mxu0 %v6534_v27  ;;  %5925 = vmatprep.mubr.f32.mxu0 %v2801_v0 }
 0x5e4   :  { %5944 = vmatprep.subr.mxu1 %v6534_v27 }
 0x5e5   :  { %5945 = vmatpush3.xpose.msra.mxu1 %v6534_v27 }
 0x5e6   :  { %5924 = vmatpush3.xpose.msra.mxu0 %v6534_v27  ;;  %5956 = vmatprep.subr.mxu1 %v6525_v16 }
 0x5e7   :  { %5935 = vmatprep.subr.mxu0 %v6539_v29 }
 0x5e8   :  { %5947 = vmatmul.mubr.f32.vlgmr.msra.gmra.mxu1 %v2809_v63 }
 0x5e9   :  { %5926 = vmatmul.mubr.f32.vlgmr.msra.gmra.mxu0 %v2811_v2  ;;  %5957 = vmatpush3.xpose.msra.mxu1 %v6525_v16 }
 0x5ea   :  { %5936 = vmatpush3.xpose.msra.mxu0 %v6539_v29  ;;  %5939 = vmatprep.mubr.f32.mxu0 %v2798_v53 }
 0x5eb   :  { %5960 = vmatprep.mubr.f32.mxu1 %v6554_v45  ;;  %5937 = vmatprep.subr.mxu0 %v6544_v37 }
 0x5ec   :  { %5958 = vmatprep.subr.mxu1 %v6534_v27 }
 0x5ed   :  { %5959 = vmatpush3.xpose.msra.mxu1 %v6534_v27 }
 0x5ee   :  { %5938 = vmatpush3.xpose.msra.mxu0 %v6544_v37 }
 0x5ef   :  { %5949 = vmatprep.subr.mxu0 %v6547_v40 }
 0x5f0   :  { %5961 = vmatmul.mubr.f32.vlgmr.msra.gmra.mxu1 %v2807_v56 }
 0x5f1   :  { %5940 = vmatmul.mubr.f32.vlgmr.msra.gmra.mxu0 %v2808_v59 }
 0x5f2   :  { %5950 = vmatpush3.xpose.msra.mxu0 %v6547_v40  ;;  %5953 = vmatprep.mubr.f32.mxu0 %v6554_v45 }
 0x5f3   :  { %5951 = vmatprep.subr.mxu0 %v6552_v44 }
 0x5f6   :  { %5952 = vmatpush3.xpose.msra.mxu0 %v6552_v44 }
 0x5f9   :  { %5954 = vmatmul.mubr.f32.vlgmr.msra.gmra.mxu0 %v2807_v56 }
 0x68f   :  { %v5892_v3 = vpop.f32.mrf.mxu1 }
 0x691   :  { %v2376_v4 = vpop.f32.mrf.mxu1 }
 0x693   :  { %v5906_v7 = vpop.f32.mrf.mxu1 }
 0x695   :  { %v2540_v11 = vpop.f32.mrf.mxu1 }
 0x697   :  { %v5885_v5 = vpop.f32.mrf.mxu0 }
 0x698   :  { %v2383_v6 = vadd.f32 %v5892_v3, %v5885_v5  ;;  %v5920_v16 = vpop.f32.mrf.mxu1 }
 0x699   :  { %v2285_v8 = vpop.f32.mrf.mxu0 }
 0x69a   :  { %v2377_v9 = vadd.f32 %v2376_v4, %v2285_v8  ;;  %v2704_v24 = vpop.f32.mrf.mxu1 }
 0x69c   :  { %v5899_v10 = vpop.f32.mrf.mxu0 }
 0x69d   :  { %v2466_v12 = vadd.f32 %v5899_v10, %v2383_v6 }
 0x69e   :  { %v2458_v13 = vpop.f32.mrf.mxu0 }
 0x69f   :  { %v2459_v14 = vadd.f32 %v2458_v13, %v2377_v9  ;;  %v2549_v15 = vadd.f32 %v5906_v7, %v2466_v12 }
 0x6a0   :  { %v5934_v28 = vpop.f32.mrf.mxu1 }
 0x6a1   :  { %v5913_v17 = vpop.f32.mrf.mxu0  ;;  %v2541_v18 = vadd.f32 %v2540_v11, %v2459_v14 }
 0x6a2   :  { %v2632_v19 = vadd.f32 %v5913_v17, %v2549_v15  ;;  %v2894_v32 = vpop.f32.mrf.mxu1 }
 0x6a3   :  { %v2625_v20 = vpop.f32.mrf.mxu0 }
 0x6a4   :  { %v2626_v21 = vadd.f32 %v2625_v20, %v2541_v18  ;;  %v6598_v22 = vadd.f32 %v5920_v16, %v2632_v19 }
 0x6a6   :  { %v6600_v25 = vadd.f32 %v2704_v24, %v2626_v21 }
 0x6a8   :  { %v5948_v37 = vpop.f32.mrf.mxu1 }
 0x6a9   :  { %v5927_v27 = vpop.f32.mrf.mxu0 }
 0x6aa   :  { %v2814_v30 = vadd.f32 %v5927_v27, %v6390_v35  ;;  %v3058_v42 = vpop.f32.mrf.mxu1 }
 0x6ab   :  { %v2803_v29 = vpop.f32.mrf.mxu0 }
 0x6ac   :  { %v2804_v31 = vadd.f32 %v2803_v29, %v6388_v33  ;;  %v2901_v36 = vadd.f32 %v5934_v28, %v2814_v30 }
 0x6ae   :  { %v2895_v40 = vadd.f32 %v2894_v32, %v2804_v31 }
 0x6b0   :  { %v5962_v44 = vpop.f32.mrf.mxu1 }
 0x6b1   :  { %v5941_v34 = vpop.f32.mrf.mxu0 }
 0x6b2   :  { %v2984_v39 = vadd.f32 %v5941_v34, %v2901_v36  ;;  %v3222_v51 = vpop.f32.mrf.mxu1 }
 0x6b3   :  { %v2976_v38 = vpop.f32.mrf.mxu0 }
 0x6b4   :  { %v2977_v41 = vadd.f32 %v2976_v38, %v2895_v40  ;;  %v3067_v43 = vadd.f32 %v5948_v37, %v2984_v39 }
 0x6b6   :  { %v3059_v47 = vadd.f32 %v3058_v42, %v2977_v41 }
 0x6b9   :  { %v5955_v45 = vpop.f32.mrf.mxu0 }
 0x6ba   :  { %v3150_v46 = vadd.f32 %v5955_v45, %v3067_v43 }
 0x6bb   :  { %v3143_v48 = vpop.f32.mrf.mxu0 }
 0x6bc   :  { %v3144_v49 = vadd.f32 %v3143_v48, %v3059_v47  ;;  %v3229_v50 = vadd.f32 %v5962_v44, %v3150_v46 }
 0x6be   :  { %v3235_v52 = vsel %vm1123_vm6, %v3229_v50, -inf  ;;  %v3223_v53 = vadd.f32 %v3222_v51, %v3144_v49 }
 0x6bf   :  { %3236 = vmax.xlane.f32.xlu1 %v3235_v52 }
 0x6c0   :  { %v3232_v54 = vsel %vm1123_vm6, %v3223_v53, -inf }
 0x6c1   :  { %3233 = vmax.xlane.f32.xlu0 %v3232_v54 }
 0x6d0   :  { %3256 = vrot.lane.b32.xlu1 %v6376_v60, %s6284_s4 }
 0x6d4   :  { %3774 = vrot.lane.b32.xlu1 %v6376_v60, %s6285_s5 }
 0x6d8   :  { %3772 = vrot.lane.b32.xlu1 %v6378_v62, %s6285_s5 }
 0x6dc   :  { %3770 = vrot.lane.b32.xlu1 %v6376_v60, %s6286_s6 }
 0x748   :  { %v3237_v55 = vpop.xlane.xlu1 %3236 }
 0x749   :  { %v3239_v56 = vsub.f32 %v3229_v50, %v3237_v55 }
 0x74a   :  { %v3234_v57 = vpop.xlane.xlu0 %3233 }
 0x74b   :  { %v3242_v58 = vmul.f32 1.442695, %v3239_v56  ;;  %v3238_v59 = vsub.f32 %v3223_v53, %v3234_v57 }
 0x74c   :  { %v3257_v61 = vpop.permute.xlu1 %3256 }
 0x74d   :  { %6190 = vpow2.f32 %v3242_v58  ;;  %v3240_v63 = vmul.f32 1.442695, %v3238_v59  ;;  %v6611_v0 = vand.u32 4294901760, %v3257_v61 }
 0x74f   :  { %6192 = vpow2.f32 %v3240_v63  ;;  %v6614_v1 = vsub.f32 %v3257_v61, %v6611_v0  ;;  %5963 = vmatprep.subr.mxu0 %v6611_v0 }
 0x750   :  { %5964 = vmatpush3.msra.mxu0 %v6611_v0  ;;  %v3775_v11 = vpop.permute.xlu1 %3774 }
 0x751   :  { %v6619_v2 = vand.u32 4294901760, %v6614_v1  ;;  %v3782_v15 = vsel %vm612_vm1, %v3775_v11, 0 }
 0x752   :  { %v6635_v19 = vand.u32 4294901760, %v3782_v15 }
 0x753   :  { %v3385_v3 = vsub.f32 %v6614_v1, %v6619_v2 }
 0x754   :  { %v3773_v16 = vpop.permute.xlu1 %3772  ;;  %v6646_v32 = vsub.f32 %v3782_v15, %v6635_v19 }
 0x755   :  { %v3386_v4 = vand.u32 4294901760, %v3385_v3  ;;  %v3780_v20 = vsel %vm612_vm1, %v3773_v16, 0 }
 0x756   :  { %v6641_v30 = vand.u32 4294901760, %v3780_v20  ;;  %v6655_v42 = vand.u32 4294901760, %v6646_v32 }
 0x757   :  { %5970 = vmatprep.subr.mxu1 %v3386_v4 }
 0x758   :  { %5971 = vmatpush3.msra.mxu1 %v3386_v4  ;;  %v6652_v39 = vsub.f32 %v3780_v20, %v6641_v30  ;;  %v3771_v47 = vpop.permute.xlu1 %3770  ;;  %v3903_v49 = vsub.f32 %v6646_v32, %v6655_v42 }
 0x759   :  { %v3778_v52 = vsel %vm612_vm1, %v3771_v47, 0 }
 0x75a   :  { %v6191_v5 = vpop.eup %6190  ;;  %v6661_v46 = vand.u32 4294901760, %v6652_v39  ;;  %v3904_v56 = vand.u32 4294901760, %v3903_v49  ;;  %v3861_v58 = vand.u32 4294901760, %v3778_v52 }
 0x75b   :  { %v3247_v6 = vsel %vm1123_vm6, %v6191_v5, 0.0 }
 0x75c   :  { %v6193_v7 = vpop.eup %6192  ;;  %3248 = vadd.xlane.f32.xlu0 %v3247_v6  ;;  %v3910_v54 = vsub.f32 %v6652_v39, %v6661_v46  ;;  %v3862_v63 = vsub.f32 %v3778_v52, %v3861_v58 }
 0x75d   :  { %v3244_v8 = vsel %vm1123_vm6, %v6193_v7, 0.0 }
 0x75e   :  { %v3911_v59 = vand.u32 4294901760, %v3910_v54 }
 0x760   :  { %3245 = vadd.xlane.f32.xlu0 %v3244_v8 }
 0x776   :  { %3254 = vrot.lane.b32.xlu0 %v6378_v62, %s6284_s4 }
 0x77a   :  { %3768 = vrot.lane.b32.xlu0 %v6378_v62, %s6286_s6 }
 0x7e5   :  { %v3249_v9 = vpop.xlane.xlu0 %3248 }
 0x7e6   :  { %6194 = vrcp.f32 %v3249_v9 }
 0x7e9   :  { %v3246_v10 = vpop.xlane.xlu0 %3245 }
 0x7ea   :  { %6196 = vrcp.f32 %v3246_v10 }
 0x7ed   :  { %v3255_v12 = vpop.permute.xlu0 %3254 }
 0x7ee   :  { %v3298_v13 = vand.u32 4294901760, %v3255_v12 }
 0x7f0   :  { %v6628_v14 = vsub.f32 %v3255_v12, %v3298_v13  ;;  %5965 = vmatprep.subr.mxu0 %v3298_v13 }
 0x7f1   :  { %5966 = vmatpush3.msra.mxu0 %v3298_v13  ;;  %v3769_v37 = vpop.permute.xlu0 %3768 }
 0x7f2   :  { %5977 = vmatprep.subr.mxu0 %v6614_v1  ;;  %v6633_v17 = vand.u32 4294901760, %v6628_v14  ;;  %v3776_v43 = vsel %vm612_vm1, %v3769_v37, 0 }
 0x7f3   :  { %v6195_v18 = vpop.eup %6194  ;;  %v6663_v48 = vand.u32 4294901760, %v3776_v43 }
 0x7f4   :  { %v3392_v21 = vsub.f32 %v6628_v14, %v6633_v17  ;;  %v3253_v24 = vmul.f32 %v6195_v18, %v6191_v5 }
 0x7f5   :  { %v3852_v55 = vsub.f32 %v3776_v43, %v6663_v48 }
 0x7f6   :  { %v3393_v27 = vand.u32 4294901760, %v3392_v21  ;;  %v3264_v28 = vsel %vm1123_vm6, %v3253_v24, 0 }
 0x7f7   :  { %v6197_v29 = vpop.eup %6196  ;;  %v6643_v31 = vand.u32 4294901760, %v3264_v28  ;;  %v3853_v61 = vand.u32 4294901760, %v3852_v55 }
 0x7f8   :  { %5972 = vmatprep.subr.mxu1 %v3393_v27  ;;  %v3251_v34 = vmul.f32 %v6197_v29, %v6193_v7 }
 0x7f9   :  { %5973 = vmatpush3.msra.mxu1 %v3393_v27  ;;  %v3344_v36 = vsub.f32 %v3264_v28, %v6643_v31 }
 0x7fa   :  { %5984 = vmatprep.subr.mxu1 %v6611_v0  ;;  %v3261_v38 = vsel %vm1123_vm6, %v3251_v34, 0 }
 0x7fb   :  { %v3333_v40 = vand.u32 4294901760, %v3261_v38  ;;  %v3345_v41 = vand.u32 4294901760, %v3344_v36 }
 0x7fd   :  { %5974 = vmatprep.mubr.f32.mxu1 %v3333_v40  ;;  %v3334_v44 = vsub.f32 %v3261_v38, %v3333_v40  ;;  %v3346_v50 = vsub.f32 %v3344_v36, %v3345_v41 }
 0x7fe   :  { %5975 = vmatmul.mubr.f32.vlgmr.msra.gmra.mxu1 %v6643_v31 }
 0x7ff   :  { %5985 = vmatpush3.msra.mxu1 %v6611_v0  ;;  %v3335_v45 = vand.u32 4294901760, %v3334_v44  ;;  %v3347_v57 = vand.u32 4294901760, %v3346_v50 }
 0x800   :  { %5986 = vmatprep.subr.mxu1 %v3298_v13 }
 0x801   :  { %5987 = vmatpush3.msra.mxu1 %v3298_v13  ;;  %5988 = vmatprep.mubr.f32.mxu1 %v3335_v45  ;;  %v3336_v51 = vsub.f32 %v3334_v44, %v3335_v45 }
 0x802   :  { %5998 = vmatprep.subr.mxu1 %v6611_v0  ;;  %5989 = vmatmul.mubr.f32.vlgmr.msra.gmra.mxu1 %v3345_v41 }
 0x803   :  { %5999 = vmatpush3.msra.mxu1 %v6611_v0  ;;  %6002 = vmatprep.mubr.f32.mxu1 %v3333_v40  ;;  %v3337_v53 = vand.u32 4294901760, %v3336_v51  ;;  %v3854_v0 = vsub.f32 %v3852_v55, %v3853_v61 }
 0x804   :  { %6000 = vmatprep.subr.mxu1 %v3298_v13 }
 0x805   :  { %6001 = vmatpush3.msra.mxu1 %v3298_v13  ;;  %5967 = vmatprep.mubr.f32.mxu0 %v3337_v53  ;;  %v3855_v3 = vand.u32 4294901760, %v3854_v0 }
 0x806   :  { %6012 = vmatprep.subr.mxu1 %v3904_v56  ;;  %5968 = vmatmul.mubr.f32.vlgmr.msra.gmra.mxu0 %v3347_v57 }
 0x807   :  { %5978 = vmatpush3.msra.mxu0 %v6614_v1  ;;  %6003 = vmatmul.mubr.f32.vlgmr.msra.gmra.mxu1 %v6643_v31  ;;  %v3863_v1 = vand.u32 4294901760, %v3862_v63 }
 0x808   :  { %6013 = vmatpush3.xpose.msra.mxu1 %v3904_v56  ;;  %5979 = vmatprep.subr.mxu0 %v6628_v14 }
 0x809   :  { %5981 = vmatprep.mubr.f32.mxu0 %v3334_v44  ;;  %6014 = vmatprep.subr.mxu1 %v3911_v59 }
 0x80a   :  { %6016 = vmatprep.mubr.f32.mxu1 %v6663_v48  ;;  %5980 = vmatpush3.msra.mxu0 %v6628_v14 }
 0x80b   :  { %5991 = vmatprep.subr.mxu0 %v6619_v2  ;;  %5982 = vmatmul.mubr.f32.vlgmr.msra.gmra.mxu0 %v3344_v36 }
 0x80c   :  { %5992 = vmatpush3.msra.mxu0 %v6619_v2  ;;  %6015 = vmatpush3.xpose.msra.mxu1 %v3911_v59  ;;  %v3864_v2 = vsub.f32 %v3862_v63, %v3863_v1 }
 0x80d   :  { %5993 = vmatprep.subr.mxu0 %v6633_v17  ;;  %5995 = vmatprep.mubr.f32.mxu0 %v3333_v40 }
 0x80e   :  { %6026 = vmatprep.subr.mxu1 %v6635_v19  ;;  %5994 = vmatpush3.msra.mxu0 %v6633_v17  ;;  %v3865_v4 = vand.u32 4294901760, %v3864_v2 }
 0x80f   :  { %6005 = vmatprep.subr.mxu0 %v6635_v19  ;;  %6017 = vmatmul.mubr.f32.vlgmr.msra.gmra.mxu1 %v3861_v58 }
 0x810   :  { %5996 = vmatmul.mubr.f32.vlgmr.msra.gmra.mxu0 %v6643_v31  ;;  %6027 = vmatpush3.xpose.msra.mxu1 %v6635_v19 }
 0x811   :  { %6006 = vmatpush3.xpose.msra.mxu0 %v6635_v19  ;;  %6030 = vmatprep.mubr.f32.mxu1 %v3853_v61 }
 0x812   :  { %6007 = vmatprep.subr.mxu0 %v6641_v30  ;;  %6009 = vmatprep.mubr.f32.mxu0 %v3855_v3 }
 0x813   :  { %6028 = vmatprep.subr.mxu1 %v6641_v30 }
 0x814   :  { %6029 = vmatpush3.xpose.msra.mxu1 %v6641_v30 }
 0x815   :  { %6008 = vmatpush3.xpose.msra.mxu0 %v6641_v30  ;;  %6040 = vmatprep.subr.mxu1 %v6635_v19 }
 0x816   :  { %6019 = vmatprep.subr.mxu0 %v6646_v32 }
 0x817   :  { %6031 = vmatmul.mubr.f32.vlgmr.msra.gmra.mxu1 %v3863_v1 }
 0x818   :  { %6010 = vmatmul.mubr.f32.vlgmr.msra.gmra.mxu0 %v3865_v4  ;;  %6041 = vmatpush3.xpose.msra.mxu1 %v6635_v19 }
 0x819   :  { %6020 = vmatpush3.xpose.msra.mxu0 %v6646_v32  ;;  %6023 = vmatprep.mubr.f32.mxu0 %v3852_v55 }
 0x81a   :  { %6044 = vmatprep.mubr.f32.mxu1 %v6663_v48  ;;  %6021 = vmatprep.subr.mxu0 %v6652_v39 }
 0x81b   :  { %6042 = vmatprep.subr.mxu1 %v6641_v30 }
 0x81c   :  { %6043 = vmatpush3.xpose.msra.mxu1 %v6641_v30 }
 0x81d   :  { %6022 = vmatpush3.xpose.msra.mxu0 %v6652_v39 }
 0x81e   :  { %6033 = vmatprep.subr.mxu0 %v6655_v42 }
 0x81f   :  { %6045 = vmatmul.mubr.f32.vlgmr.msra.gmra.mxu1 %v3861_v58 }
 0x820   :  { %6024 = vmatmul.mubr.f32.vlgmr.msra.gmra.mxu0 %v3862_v63 }
 0x821   :  { %6034 = vmatpush3.xpose.msra.mxu0 %v6655_v42  ;;  %6037 = vmatprep.mubr.f32.mxu0 %v6663_v48 }
 0x822   :  { %6035 = vmatprep.subr.mxu0 %v6661_v46 }
 0x825   :  { %6036 = vmatpush3.xpose.msra.mxu0 %v6661_v46 }
 0x828   :  { %6038 = vmatmul.mubr.f32.vlgmr.msra.gmra.mxu0 %v3861_v58 }
 0x8be   :  { %v5976_v5 = vpop.f32.mrf.mxu1 }
 0x8c0   :  { %v3430_v6 = vpop.f32.mrf.mxu1 }
 0x8c2   :  { %v5990_v8 = vpop.f32.mrf.mxu1 }
 0x8c4   :  { %v3594_v12 = vpop.f32.mrf.mxu1 }
 0x8c6   :  { %v5969_v7 = vpop.f32.mrf.mxu0 }
 0x8c7   :  { %v6004_v15 = vpop.f32.mrf.mxu1  ;;  %v3437_v52 = vadd.f32 %v5976_v5, %v5969_v7 }
 0x8c8   :  { %v3339_v9 = vpop.f32.mrf.mxu0 }
 0x8c9   :  { %v3431_v10 = vadd.f32 %v3430_v6, %v3339_v9  ;;  %v3758_v20 = vpop.f32.mrf.mxu1 }
 0x8cb   :  { %v5983_v11 = vpop.f32.mrf.mxu0 }
 0x8cc   :  { %v3520_v53 = vadd.f32 %v5983_v11, %v3437_v52 }
 0x8cd   :  { %v3512_v13 = vpop.f32.mrf.mxu0 }
 0x8ce   :  { %v3513_v14 = vadd.f32 %v3512_v13, %v3431_v10  ;;  %v3603_v54 = vadd.f32 %v5990_v8, %v3520_v53 }
 0x8cf   :  { %v6018_v27 = vpop.f32.mrf.mxu1 }
 0x8d0   :  { %v5997_v16 = vpop.f32.mrf.mxu0  ;;  %v3595_v17 = vadd.f32 %v3594_v12, %v3513_v14 }
 0x8d1   :  { %v3948_v31 = vpop.f32.mrf.mxu1  ;;  %v3686_v55 = vadd.f32 %v5997_v16, %v3603_v54 }
 0x8d2   :  { %v3679_v18 = vpop.f32.mrf.mxu0 }
 0x8d3   :  { %v3680_v19 = vadd.f32 %v3679_v18, %v3595_v17  ;;  %v3765_v56 = vadd.f32 %v6004_v15, %v3686_v55 }
 0x8d5   :  { %v6705_v21 = vadd.f32 %v3758_v20, %v3680_v19 }
 0x8d7   :  { %v6032_v36 = vpop.f32.mrf.mxu1 }
 0x8d8   :  { %v6011_v24 = vpop.f32.mrf.mxu0 }
 0x8d9   :  { %v3868_v29 = vadd.f32 %v6011_v24, %v6390_v35  ;;  %v4112_v41 = vpop.f32.mrf.mxu1 }
 0x8da   :  { %v3857_v28 = vpop.f32.mrf.mxu0 }
 0x8db   :  { %v3858_v30 = vadd.f32 %v3857_v28, %v6388_v33  ;;  %v3955_v34 = vadd.f32 %v6018_v27, %v3868_v29 }
 0x8dd   :  { %v3949_v39 = vadd.f32 %v3948_v31, %v3858_v30 }
 0x8df   :  { %v6046_v43 = vpop.f32.mrf.mxu1 }
 0x8e0   :  { %v6025_v32 = vpop.f32.mrf.mxu0 }
 0x8e1   :  { %v4038_v38 = vadd.f32 %v6025_v32, %v3955_v34  ;;  %v4276_v35 = vpop.f32.mrf.mxu1 }
 0x8e2   :  { %v4030_v37 = vpop.f32.mrf.mxu0 }
 0x8e3   :  { %v4031_v40 = vadd.f32 %v4030_v37, %v3949_v39  ;;  %v4121_v42 = vadd.f32 %v6032_v36, %v4038_v38  ;;  %v4857_v37 = vld [vmem:[#allocation5 + $0x38] sm:$0xff] }
 0x8e4   :  { %v6729_v38 = vand.u32 4294901760, %v4857_v37 }
 0x8e5   :  { %v4113_v46 = vadd.f32 %v4112_v41, %v4031_v40 }
 0x8e6   :  { %v6732_v39 = vsub.f32 %v4857_v37, %v6729_v38 }
 0x8e8   :  { %v6039_v44 = vpop.f32.mrf.mxu0  ;;  %v6737_v40 = vand.u32 4294901760, %v6732_v39 }
 0x8e9   :  { %v4204_v45 = vadd.f32 %v6039_v44, %v4121_v42 }
 0x8ea   :  { %v4197_v47 = vpop.f32.mrf.mxu0  ;;  %v4989_v41 = vsub.f32 %v6732_v39, %v6737_v40 }
 0x8eb   :  { %v4198_v48 = vadd.f32 %v4197_v47, %v4113_v46  ;;  %v4283_v49 = vadd.f32 %v6046_v43, %v4204_v45  ;;  %v4856_v43 = vld [vmem:[#allocation5 + $0x30] sm:$0xff]  ;;  %v4855_v46 = vld [vmem:[#allocation5 + $0x28] sm:$0xff] }
 0x8ec   :  { %v4990_v42 = vand.u32 4294901760, %v4989_v41  ;;  %v6741_v44 = vand.u32 4294901760, %v4856_v43 }
 0x8ed   :  { %v4289_v33 = vsel %vm1123_vm6, %v4283_v49, -inf  ;;  %v4277_v50 = vadd.f32 %v4276_v35, %v4198_v48  ;;  %v6746_v48 = vand.u32 4294901760, %v4855_v46 }
 0x8ee   :  { %4290 = vmax.xlane.f32.xlu1 %v4289_v33  ;;  %v6744_v47 = vsub.f32 %v4856_v43, %v6741_v44 }
 0x8ef   :  { %v4286_v51 = vsel %vm1123_vm6, %v4277_v50, -inf  ;;  %v6754_v33 = vsub.f32 %v4855_v46, %v6746_v48 }
 0x8f0   :  { %4287 = vmax.xlane.f32.xlu0 %v4286_v51  ;;  %v6751_v35 = vand.u32 4294901760, %v6744_v47 }
 0x8f1   :  { %v6763_v53 = vand.u32 4294901760, %v6754_v33 }
 0x8f2   :  { %v4996_v52 = vsub.f32 %v6744_v47, %v6751_v35 }
 0x8f4   :  { %v4997_v55 = vand.u32 4294901760, %v4996_v52 }
 0x8ff   :  { %4310 = vrot.lane.b32.xlu1 %v6376_v60, %s6287_s7 }
 0x903   :  { %4824 = vrot.lane.b32.xlu1 %v6600_v25, %s6274_s16 }
 0x907   :  { %4826 = vrot.lane.b32.xlu1 %v6598_v22, %s6274_s16 }
 0x90b   :  { %4834 = vrot.lane.b32.xlu1 %v3765_v56, %s6288_s8  ;;  %v5003_v56 = vsub.f32 %v6754_v33, %v6763_v53 }
 0x977   :  { %v4291_v57 = vpop.xlane.xlu1 %4290 }
 0x978   :  { %v4293_v58 = vsub.f32 %v4283_v49, %v4291_v57  ;;  %v4854_v49 = vld [vmem:[#allocation5 + $0x20] sm:$0xff] }
 0x979   :  { %v4288_v59 = vpop.xlane.xlu0 %4287 }
 0x97a   :  { %v4296_v61 = vmul.f32 1.442695, %v4293_v58  ;;  %v4292_v63 = vsub.f32 %v4277_v50, %v4288_v59  ;;  %v6756_v50 = vand.u32 4294901760, %v4854_v49 }
 0x97b   :  { %v4311_v0 = vpop.permute.xlu1 %4310 }
 0x97c   :  { %6198 = vpow2.f32 %v4296_v61  ;;  %v4294_v1 = vmul.f32 1.442695, %v4292_v63  ;;  %v4349_v60 = vand.u32 4294901760, %v4311_v0  ;;  %v6766_v54 = vsub.f32 %v4854_v49, %v6756_v50 }
 0x97d   :  { %v5004_v61 = vand.u32 4294901760, %v5003_v56 }
 0x97e   :  { %6200 = vpow2.f32 %v4294_v1  ;;  %v4437_v3 = vsub.f32 %v4311_v0, %v4349_v60  ;;  %6047 = vmatprep.subr.mxu0 %v4349_v60  ;;  %v6773_v57 = vand.u32 4294901760, %v6766_v54 }
 0x97f   :  { %6048 = vmatpush3.msra.mxu0 %v4349_v60 }
 0x980   :  { %v6717_v25 = vand.u32 4294901760, %v4437_v3  ;;  %v5010_v63 = vsub.f32 %v6766_v54, %v6773_v57 }
 0x982   :  { %v4439_v22 = vsub.f32 %v4437_v3, %v6717_v25 }
 0x984   :  { %v4440_v2 = vand.u32 4294901760, %v4439_v22 }
 0x986   :  { %6054 = vmatprep.subr.mxu1 %v4440_v2 }
 0x987   :  { %6055 = vmatpush3.msra.mxu1 %v4440_v2 }
 0x989   :  { %v6199_v4 = vpop.eup %6198 }
 0x98a   :  { %v4301_v5 = vsel %vm1123_vm6, %v6199_v4, 0.0 }
 0x98b   :  { %v6201_v6 = vpop.eup %6200  ;;  %4302 = vadd.xlane.f32.xlu0 %v4301_v5 }
 0x98c   :  { %v4298_v7 = vsel %vm1123_vm6, %v6201_v6, 0.0 }
 0x98f   :  { %4299 = vadd.xlane.f32.xlu0 %v4298_v7 }
 0x9a5   :  { %4308 = vrot.lane.b32.xlu0 %v6378_v62, %s6287_s7 }
 0x9a9   :  { %4832 = vrot.lane.b32.xlu0 %v6705_v21, %s6288_s8 }
 0xa14   :  { %v4303_v8 = vpop.xlane.xlu0 %4302 }
 0xa15   :  { %6202 = vrcp.f32 %v4303_v8 }
 0xa18   :  { %v4300_v9 = vpop.xlane.xlu0 %4299 }
 0xa19   :  { %6204 = vrcp.f32 %v4300_v9 }
 0xa1c   :  { %v4309_v10 = vpop.permute.xlu0 %4308 }
 0xa1d   :  { %v4352_v11 = vand.u32 4294901760, %v4309_v10 }
 0xa1f   :  { %v4444_v12 = vsub.f32 %v4309_v10, %v4352_v11  ;;  %6049 = vmatprep.subr.mxu0 %v4352_v11 }
 0xa20   :  { %6050 = vmatpush3.msra.mxu0 %v4352_v11 }
 0xa21   :  { %6061 = vmatprep.subr.mxu0 %v4437_v3  ;;  %v4445_v13 = vand.u32 4294901760, %v4444_v12 }
 0xa22   :  { %v6203_v14 = vpop.eup %6202 }
 0xa23   :  { %v4446_v15 = vsub.f32 %v4444_v12, %v4445_v13  ;;  %v4307_v16 = vmul.f32 %v6203_v14, %v6199_v4 }
 0xa25   :  { %v4447_v17 = vand.u32 4294901760, %v4446_v15  ;;  %v4318_v18 = vsel %vm1123_vm6, %v4307_v16, 0  ;;  %v4825_v16 = vpop.permute.xlu1 %4824 }
 0xa26   :  { %v6205_v62 = vpop.eup %6204  ;;  %v4397_v19 = vand.u32 4294901760, %v4318_v18 }
 0xa27   :  { %6056 = vmatprep.subr.mxu1 %v4447_v17  ;;  %v4305_v20 = vmul.f32 %v6205_v62, %v6201_v6  ;;  %v4833_v62 = vpop.permute.xlu0 %4832 }
 0xa28   :  { %6057 = vmatpush3.msra.mxu1 %v4447_v17  ;;  %v4398_v21 = vsub.f32 %v4318_v18, %v4397_v19 }
 0xa29   :  { %6068 = vmatprep.subr.mxu1 %v4349_v60  ;;  %v4315_v24 = vsel %vm1123_vm6, %v4305_v20, 0  ;;  %v4827_v17 = vpop.permute.xlu1 %4826 }
 0xa2a   :  { %v4387_v27 = vand.u32 4294901760, %v4315_v24  ;;  %v4399_v28 = vand.u32 4294901760, %v4398_v21 }
 0xa2c   :  { %6058 = vmatprep.mubr.f32.mxu1 %v4387_v27  ;;  %v4388_v29 = vsub.f32 %v4315_v24, %v4387_v27  ;;  %v4400_v31 = vsub.f32 %v4398_v21, %v4399_v28  ;;  %v4846_v24 = vsel %vm612_vm1, %v6495_v26, %v4825_v16 }
 0xa2d   :  { %6059 = vmatmul.mubr.f32.vlgmr.msra.gmra.mxu1 %v4397_v19  ;;  %v4835_v18 = vpop.permute.xlu1 %4834 }
 0xa2e   :  { %6069 = vmatpush3.msra.mxu1 %v4349_v60  ;;  %v4389_v30 = vand.u32 4294901760, %v4388_v29  ;;  %v4401_v36 = vand.u32 4294901760, %v4400_v31 }
 0xa2f   :  { %6070 = vmatprep.subr.mxu1 %v4352_v11 }
 0xa30   :  { %6071 = vmatpush3.msra.mxu1 %v4352_v11  ;;  %6072 = vmatprep.mubr.f32.mxu1 %v4389_v30  ;;  %v4390_v32 = vsub.f32 %v4388_v29, %v4389_v30 }
 0xa31   :  { %6082 = vmatprep.subr.mxu1 %v4349_v60  ;;  %6073 = vmatmul.mubr.f32.vlgmr.msra.gmra.mxu1 %v4399_v28  ;;  %v4848_v28 = vsel %vm1123_vm6, %v4846_v24, %v4833_v62 }
 0xa32   :  { %6083 = vmatpush3.msra.mxu1 %v4349_v60  ;;  %6086 = vmatprep.mubr.f32.mxu1 %v4387_v27  ;;  %v4391_v34 = vand.u32 4294901760, %v4390_v32  ;;  %v5011_v60 = vand.u32 4294901760, %v5010_v63 }
 0xa33   :  { %6084 = vmatprep.subr.mxu1 %v4352_v11 }
 0xa34   :  { %6085 = vmatpush3.msra.mxu1 %v4352_v11  ;;  %6051 = vmatprep.mubr.f32.mxu0 %v4391_v34 }
 0xa35   :  { %6052 = vmatmul.mubr.f32.vlgmr.msra.gmra.mxu0 %v4401_v36  ;;  %6087 = vmatmul.mubr.f32.vlgmr.msra.gmra.mxu1 %v4397_v19 }
 0xa36   :  { %6062 = vmatpush3.msra.mxu0 %v4437_v3  ;;  %6065 = vmatprep.mubr.f32.mxu0 %v4388_v29 }
 0xa37   :  { %6063 = vmatprep.subr.mxu0 %v4444_v12  ;;  %6100 = vmatprep.subr.mxu1 %v4990_v42 }
 0xa38   :  { %6064 = vmatpush3.msra.mxu0 %v4444_v12  ;;  %6101 = vmatpush3.msra.mxu1 %v4990_v42 }
 0xa39   :  { %6075 = vmatprep.subr.mxu0 %v6717_v25  ;;  %6066 = vmatmul.mubr.f32.vlgmr.msra.gmra.mxu0 %v4398_v21 }
 0xa3a   :  { %6076 = vmatpush3.msra.mxu0 %v6717_v25  ;;  %6079 = vmatprep.mubr.f32.mxu0 %v4387_v27 }
 0xa3b   :  { %6077 = vmatprep.subr.mxu0 %v4445_v13  ;;  %6102 = vmatprep.subr.mxu1 %v4997_v55 }
 0xa3c   :  { %6078 = vmatpush3.msra.mxu0 %v4445_v13  ;;  %6103 = vmatpush3.msra.mxu1 %v4997_v55 }
 0xa3d   :  { %6080 = vmatmul.mubr.f32.vlgmr.msra.gmra.mxu0 %v4397_v19  ;;  %6089 = vmatprep.subr.mxu0 %v6729_v38  ;;  %v4847_v19 = vsel %vm612_vm1, %v6493_v23, %v4827_v17 }
 0xa3e   :  { %6090 = vmatpush3.msra.mxu0 %v6729_v38  ;;  %6104 = vmatprep.subr.mxu1 %v5004_v61  ;;  %v4849_v20 = vsel %vm1123_vm6, %v4847_v19, %v4835_v18 }
 0xa3f   :  { %6091 = vmatprep.subr.mxu0 %v6741_v44  ;;  %6105 = vmatpush3.msra.mxu1 %v5004_v61 }
 0xa40   :  { %6092 = vmatpush3.msra.mxu0 %v6741_v44  ;;  %6106 = vmatprep.subr.mxu1 %v5011_v60 }
 0xa41   :  { %6093 = vmatprep.subr.mxu0 %v6746_v48  ;;  %6107 = vmatpush3.msra.mxu1 %v5011_v60 }
 0xa42   :  { %6094 = vmatpush3.msra.mxu0 %v6746_v48  ;;  %6122 = vmatprep.subr.mxu1 %v6729_v38 }
 0xa43   :  { %6095 = vmatprep.subr.mxu0 %v6756_v50 }
 0xa44   :  { %6096 = vmatpush3.msra.mxu0 %v6756_v50 }
 0xa45   :  { %6111 = vmatprep.subr.mxu0 %v6732_v39 }
 0xaed   :  { %v6060_v45 = vpop.f32.mrf.mxu1 }
 0xaef   :  { %v4484_v51 = vpop.f32.mrf.mxu1 }
 0xaf1   :  { %v6074_v58 = vpop.f32.mrf.mxu1 }
 0xaf3   :  { %v4648_v3 = vpop.f32.mrf.mxu1 }
 0xaf5   :  { %v6053_v59 = vpop.f32.mrf.mxu0  ;;  %v6088_v7 = vpop.f32.mrf.mxu1 }
 0xaf6   :  { %v4491_v1 = vadd.f32 %v6060_v45, %v6053_v59 }
 0xaf7   :  { %v4393_v0 = vpop.f32.mrf.mxu0  ;;  %v4812_v14 = vpop.f32.mrf.mxu1 }
 0xaf8   :  { %v4485_v22 = vadd.f32 %v4484_v51, %v4393_v0 }
 0xaf9   :  { %v6067_v25 = vpop.f32.mrf.mxu0 }
 0xafa   :  { %v4574_v2 = vadd.f32 %v6067_v25, %v4491_v1 }
 0xafb   :  { %v4566_v4 = vpop.f32.mrf.mxu0 }
 0xafc   :  { %v4567_v5 = vadd.f32 %v4566_v4, %v4485_v22  ;;  %v4657_v6 = vadd.f32 %v6074_v58, %v4574_v2 }
 0xafd   :  { %v6081_v8 = vpop.f32.mrf.mxu0 }
 0xafe   :  { %v4740_v9 = vadd.f32 %v6081_v8, %v4657_v6  ;;  %v4649_v10 = vadd.f32 %v4648_v3, %v4567_v5 }
 0xaff   :  { %v4733_v11 = vpop.f32.mrf.mxu0 }
 0xb00   :  { %v4819_v12 = vadd.f32 %v6088_v7, %v4740_v9  ;;  %v4734_v13 = vadd.f32 %v4733_v11, %v4649_v10 }
 0xb02   :  { %v4813_v15 = vadd.f32 %v4812_v14, %v4734_v13  ;;  %4842 = vrot.lane.b32.xlu1 %v4819_v12, %s6289_s9 }
 0xb04   :  { %4840 = vrot.lane.b32.xlu0 %v4813_v15, %s6289_s9 }
 0xb74   :  { %v4843_v21 = vpop.permute.xlu1 %4842 }
 0xb75   :  { %v4852_v27 = vsel %vm4850_vm7, %v4849_v20, %v4843_v21 }
 0xb76   :  { %v4870_v29 = vsel %vm56_vm0, %v4852_v27, 0  ;;  %v4841_v30 = vpop.permute.xlu0 %4840 }
 0xb77   :  { %v4951_v31 = vand.u32 4294901760, %v4870_v29  ;;  %v4851_v32 = vsel %vm4850_vm7, %v4848_v28, %v4841_v30 }
 0xb78   :  { %v4867_v34 = vsel %vm56_vm0, %v4851_v32, 0 }
 0xb79   :  { %v4952_v36 = vsub.f32 %v4870_v29, %v4951_v31  ;;  %v4941_v37 = vand.u32 4294901760, %v4867_v34 }
 0xb7b   :  { %v4942_v41 = vsub.f32 %v4867_v34, %v4941_v37  ;;  %6108 = vmatprep.mubr.f32.mxu1 %v4941_v37  ;;  %v4953_v23 = vand.u32 4294901760, %v4952_v36 }
 0xb7c   :  { %6109 = vmatmul.mubr.f32.vlgmr.msra.gmra.mxu1 %v4951_v31 }
 0xb7d   :  { %6123 = vmatpush3.msra.mxu1 %v6729_v38  ;;  %v4943_v42 = vand.u32 4294901760, %v4942_v41  ;;  %v4954_v43 = vsub.f32 %v4952_v36, %v4953_v23 }
 0xb7e   :  { %6124 = vmatprep.subr.mxu1 %v6741_v44 }
 0xb7f   :  { %6125 = vmatpush3.msra.mxu1 %v6741_v44  ;;  %6130 = vmatprep.mubr.f32.mxu1 %v4943_v42  ;;  %v4944_v26 = vsub.f32 %v4942_v41, %v4943_v42  ;;  %v4955_v46 = vand.u32 4294901760, %v4954_v43 }
 0xb80   :  { %6126 = vmatprep.subr.mxu1 %v6746_v48 }
 0xb81   :  { %6127 = vmatpush3.msra.mxu1 %v6746_v48  ;;  %v4945_v45 = vand.u32 4294901760, %v4944_v26 }
 0xb82   :  { %6128 = vmatprep.subr.mxu1 %v6756_v50 }
 0xb83   :  { %6129 = vmatpush3.msra.mxu1 %v6756_v50  ;;  %6097 = vmatprep.mubr.f32.mxu0 %v4945_v45 }
 0xb84   :  { %6131 = vmatmul.mubr.f32.vlgmr.msra.gmra.mxu1 %v4953_v23  ;;  %6144 = vmatprep.subr.mxu1 %v6729_v38 }
 0xb85   :  { %6098 = vmatmul.mubr.f32.vlgmr.msra.gmra.mxu0 %v4955_v46  ;;  %6145 = vmatpush3.msra.mxu1 %v6729_v38 }
 0xb86   :  { %6112 = vmatpush3.msra.mxu0 %v6732_v39  ;;  %6152 = vmatprep.mubr.f32.mxu1 %v4941_v37  ;;  %v5422_v39 = vld [vmem:[%s6828_s2 + $0x1] ss:$0 sm:$0xff]  ;;  %s6290_s2 = smov [#allocation7]  }
 0xb87   :  { %6113 = vmatprep.subr.mxu0 %v6744_v47  ;;  %6119 = vmatprep.mubr.f32.mxu0 %v4942_v41  ;;  %s5407_s12 = sshll.u32 %s6290_s2, 4  ;;  %s5408_s12 = int_to_ptr.vmem [resolvable:$true] %s5407_s12 }
 0xb88   :  { %6146 = vmatprep.subr.mxu1 %v6741_v44  ;;  %6114 = vmatpush3.msra.mxu0 %v6744_v47  ;;  %s6246_s13 = scalar_lea.vmem %s5408_s12, 256  ;;  %p6251_p11 = scmp.lt.s32.totalorder %s5408_s12, %s5408_s12 }
 0xb89   :  { %6147 = vmatpush3.msra.mxu1 %v6741_v44  ;;  %6115 = vmatprep.subr.mxu0 %v6754_v33  ;;  %p6247_p10 = scmp.ne.s32.totalorder %s5408_s12, %s6246_s13  ;;  %p6252_p12 = scmp.lt.s32.totalorder %s6246_s13, %s6246_s13 }
 0xb8a   :  { %6148 = vmatprep.subr.mxu1 %v6746_v48  ;;  %6116 = vmatpush3.msra.mxu0 %v6754_v33 }
 0xb8b   :  { %6149 = vmatpush3.msra.mxu1 %v6746_v48  ;;  %6117 = vmatprep.subr.mxu0 %v6766_v54  ;;  %p6253_p13 = por %p6252_p12, %p6251_p11 }
 0xb8c   :  { %6150 = vmatprep.subr.mxu1 %v6756_v50  ;;  %6118 = vmatpush3.msra.mxu0 %v6766_v54 }
 0xb8d   :  { %6151 = vmatpush3.msra.mxu1 %v6756_v50  ;;  %6120 = vmatmul.mubr.f32.vlgmr.msra.gmra.mxu0 %v4952_v36  ;;  %p6254_p0 = pnand %p6253_p13, %p6247_p10 }
 0xb8e   :  { %6133 = vmatprep.subr.mxu0 %v6737_v40  ;;  %6153 = vmatmul.mubr.f32.vlgmr.msra.gmra.mxu1 %v4951_v31 }
 0xb8f   :  { %6134 = vmatpush3.msra.mxu0 %v6737_v40  ;;  %6141 = vmatprep.mubr.f32.mxu0 %v4941_v37 }
 0xb90   :  { %6135 = vmatprep.subr.mxu0 %v6751_v35 }
 0xb91   :  { %6136 = vmatpush3.msra.mxu0 %v6751_v35 }
 0xb92   :  { %6137 = vmatprep.subr.mxu0 %v6763_v53 }
 0xb93   :  { %6138 = vmatpush3.msra.mxu0 %v6763_v53 }
 0xb94   :  { %6139 = vmatprep.subr.mxu0 %v6773_v57 }
 0xb95   :  { %6140 = vmatpush3.msra.mxu0 %v6773_v57 }
 0xb96   :  { %6142 = vmatmul.mubr.f32.vlgmr.msra.gmra.mxu0 %v4951_v31 }
 0xc3c   :  { %v6110_v40 = vpop.f32.mrf.mxu1 }
 0xc3e   :  { %v5048_v35 = vpop.f32.mrf.mxu1 }
 0xc44   :  { %v6132_v50 = vpop.f32.mrf.mxu1 }
 0xc45   :  { %v6099_v38 = vpop.f32.mrf.mxu0 }
 0xc46   :  { %v4958_v47 = vadd.f32 %v6099_v38, %v5422_v39  ;;  %v5218_v55 = vpop.f32.mrf.mxu1 }
 0xc47   :  { %v4947_v44 = vpop.f32.mrf.mxu0 }
 0xc48   :  { %v4948_v48 = vadd.f32 %v5422_v39, %v4947_v44  ;;  %v5055_v33 = vadd.f32 %v6110_v40, %v4958_v47 }
 0xc4a   :  { %v5049_v53 = vadd.f32 %v5048_v35, %v4948_v48 }
 0xc4d   :  { %v6121_v49 = vpop.f32.mrf.mxu0 }
 0xc4e   :  { %v5142_v52 = vadd.f32 %v6121_v49, %v5055_v33  ;;  %v6154_v57 = vpop.f32.mrf.mxu1 }
 0xc4f   :  { %v5134_v51 = vpop.f32.mrf.mxu0 }
 0xc50   :  { %v5135_v54 = vadd.f32 %v5134_v51, %v5049_v53  ;;  %v5227_v56 = vadd.f32 %v6132_v50, %v5142_v52  ;;  %v5390_v60 = vpop.f32.mrf.mxu1 }
 0xc52   :  { %v5219_v61 = vadd.f32 %v5218_v55, %v5135_v54 }
 0xc56   :  { %v6143_v58 = vpop.f32.mrf.mxu0 }
 0xc57   :  { %v5316_v59 = vadd.f32 %v6143_v58, %v5227_v56 }
 0xc58   :  { %v5309_v63 = vpop.f32.mrf.mxu0 }
 0xc59   :  { %v5397_v0 = vadd.f32 %v6154_v57, %v5316_v59  ;;  %v5310_v1 = vadd.f32 %v5309_v63, %v5219_v61 }
 0xc5b   :  { %5401 = vst [vmem:[#allocation7 + $0x8] sm:$0xff] %v5397_v0  ;;  %v5391_v3 = vadd.f32 %v5390_v60, %v5310_v1 }
 0xc5d   :  { %5400 = vst [vmem:[#allocation7] sm:$0xff] %v5391_v3 }
 0xc5e   :  { %6257 = shalt.err (!%p6254_p0)
}
 0xc5f   :  { %5413 = dma.vmem_to_hbm [thread:$0]  %s5408_s12, 256, %s6829_s3, [#allocation4], %s6273_s15, %s6273_s15, %s6274_s16  }
 0xc60   :  { %6270 = dma.done.wait [#allocation4], 256  }
 0xc61   :  { %6271 = vsyncadd [#allocation4], 4294967040 }
 0xc62   :  { %5417 = vsyncpa [#allocation3], 1 }
 0xc63   :  { %5418 = vsyncpa [#allocation6], 1 }
 0xc64   :  { %5419 = vsyncpa [#allocation4], 1 }

</bundles_post_ra>
